<compile_context>
chip_gen: v7x
topology: tpu7x:2x2x1
jax: 0.10.0
libtpu: 0.0.40
codegen_flags: <defaults>
</compile_context>

<pallas_src>
import functools

import jax
import jax.numpy as jnp
from jax import lax
from jax.experimental import pallas as pl
from jax.experimental.pallas import tpu as pltpu


def _sk_kernel(x_ref, sel_ref, w_ref, gamma_ref, beta_ref, w1_ref, b1_ref,
               w2_ref, p_ref, pt_ref, a_ref, o_ref, *,
               M, C_out, L_out, BB, inv_n, inv_lo, eps):
    f32 = jnp.float32
    x = x_ref[...]                                     # (C_in, BB*L)  bf16
    P = p_ref[...]                                     # (BB*L_out, BB)   per-batch lane pooling
    PT = pt_ref[...]                                   # (BB, BB*L_out)   per-batch lane broadcast
    A = a_ref[...]                                     # (C_out, C_out)   same-group membership

    # Center tap (k=1) gathers x[:, stride*t] identically for every branch ->
    # compute it once (exact 0/1 selector, so bf16 result is lossless).
    xc = jnp.dot(x, sel_ref[0, 1],
                 preferred_element_type=f32).astype(jnp.bfloat16)

    branch = []
    for i in range(M):                                 # M = 2 branches, unrolled
        x0 = jnp.dot(x, sel_ref[i, 0],
                     preferred_element_type=f32).astype(jnp.bfloat16)
        x2 = jnp.dot(x, sel_ref[i, 2],
                     preferred_element_type=f32).astype(jnp.bfloat16)
        # Stack taps along the contraction (sublane) axis: one fat MXU matmul
        # per branch instead of 3 skinny ones.
        xs = jnp.concatenate([x0, xc, x2], axis=0)     # (3*C_in, BB*L_out) bf16
        acc = jnp.dot(w_ref[i], xs,
                      preferred_element_type=f32)      # (C_out, BB*L_out) f32

        # GroupNorm: per-(batch, group) statistics via constant pooling matmuls
        # (lane pool with P, same-group channel pool with A).  Kept in f32.
        s1 = jnp.dot(acc, P, preferred_element_type=f32)          # (C_out, BB)
        s2 = jnp.dot(acc * acc, P, preferred_element_type=f32)    # (C_out, BB)
        mean_c = jnp.dot(A, s1, preferred_element_type=f32) * inv_n
        msq_c = jnp.dot(A, s2, preferred_element_type=f32) * inv_n
        var_c = jnp.maximum(msq_c - mean_c * mean_c, 0.0)         # clamp cancellation
        rstd_c = lax.rsqrt(var_c + eps)
        mean_l = jnp.dot(mean_c, PT, preferred_element_type=f32)  # (C_out, BB*L_out)
        rstd_l = jnp.dot(rstd_c, PT, preferred_element_type=f32)
        y = (acc - mean_l) * rstd_l
        y = y * gamma_ref[i] + beta_ref[i]                         # (C_out, 1) broadcast
        branch.append(jnp.maximum(y, 0.0))                         # ReLU

    U = branch[0]
    for i in range(1, M):
        U = U + branch[i]

    # Squeeze-excite attention (one column per batch element).
    s = jnp.dot(U, P, preferred_element_type=f32) * inv_lo         # (C_out, BB)
    z = jnp.dot(w1_ref[...], s, preferred_element_type=f32) + b1_ref[...]
    z = jnp.maximum(z, 0.0)                                        # (d, BB)
    logits = [jnp.dot(w2_ref[m], z, preferred_element_type=f32)    # (C_out, BB)
              for m in range(M)]

    # Softmax over the M branches.
    mx = logits[0]
    for m in range(1, M):
        mx = jnp.maximum(mx, logits[m])
    exps = [jnp.exp(l - mx) for l in logits]
    denom = exps[0]
    for m in range(1, M):
        denom = denom + exps[m]
    inv_den = pl.reciprocal(denom, approx=True)                    # EUP slot

    out = jnp.zeros((C_out, BB * L_out), f32)
    for m in range(M):
        att_l = jnp.dot(exps[m] * inv_den, PT, preferred_element_type=f32)
        out = out + att_l * branch[m]
    o_ref[...] = out


def _one_hot_selectors(M, L, L_out, stride, BB):
    """(M, 3, BB*L, BB*L_out) one-hot column selectors, block-diagonal over BB.

    Selector (i, k) picks x[:, stride*t + (k-1)*(1+i)] (zero column if out of
    range -> realizes the conv's zero padding, since pad == dilation == 1+i).
    """
    eye = jnp.eye(BB, dtype=jnp.float32)
    src = jnp.arange(L, dtype=jnp.int32)[:, None]
    dst = jnp.arange(L_out, dtype=jnp.int32)[None, :]
    sels = []
    for i in range(M):
        dil = 1 + i
        taps = []
        for k in range(3):
            sel = (src == stride * dst + (k - 1) * dil).astype(jnp.float32)
            big = jnp.einsum("bc,st->bsct", eye, sel).reshape(BB * L, BB * L_out)
            taps.append(big)
        sels.append(jnp.stack(taps))
    return jnp.stack(sels)


def sk_conv(x, wconv, gamma, beta, w1, b1, w2, *, stride=2, num_groups=10,
            eps=1e-5, batch_block=None):
    """SKConv forward.

    x     : (B, C_in, L)            f32
    wconv : (M, C_out, C_in, 3)     PyTorch Conv1d weight layout per branch
    gamma, beta : (M, C_out)        GroupNorm affine per branch
    w1 : (d, C_out), b1 : (d,)      fc1 (1x1 conv with bias)
    w2 : (M*C_out, d)               fc2 (1x1 conv, no bias); rows split (M, C_out)
                                    row-major, matching a_b.reshape(B, M, C_out, -1)
    returns (B, C_out, L_out)
    """
    B, C_in, L = x.shape
    M, C_out, c_in2, ktaps = wconv.shape
    assert c_in2 == C_in and ktaps == 3
    G = num_groups
    assert C_out % G == 0, "GroupNorm requires out_channels % num_groups == 0"
    d = w1.shape[0]
    assert w2.shape == (M * C_out, d)

    L_out = (L - 1) // stride + 1
    for i in range(M):                       # pad = dil = 1+i => same L_out per branch
        dil = pad = 1 + i
        assert (L + 2 * pad - 2 * dil - 1) // stride + 1 == L_out

    BB = B if batch_block is None else batch_block   # on v7x: ceil(B/2) keeps 2 TCs busy
    assert B % BB == 0
    nb = B // BB
    if nb > 1:
        # Non-full lane blocks must stay (8,128)-tile friendly.
        assert (BB * L) % 128 == 0 and (BB * L_out) % 128 == 0
    # TODO(synk): for long sequences add an L_out grid axis with per-tile
    # selectors (or pl.ds strided gathers) and set vmem_limit_bytes; the
    # block-diagonal selectors are O((BB*L)*(BB*L_out)) and sized for small
    # L / small batch blocks only.

    # Fold batch onto the lane axis; bf16 operands for the MXU conv matmuls.
    x_lanes = jnp.transpose(x, (1, 0, 2)).reshape(C_in, B * L).astype(jnp.bfloat16)
    # Fold the 3 taps into the contraction axis (tap-major to match the stacked
    # gathers inside the kernel).
    w_wide = jnp.transpose(wconv, (0, 1, 3, 2)).reshape(M, C_out, 3 * C_in)
    w_wide = w_wide.astype(jnp.bfloat16)
    sel = _one_hot_selectors(M, L, L_out, stride, BB).astype(jnp.bfloat16)

    gamma_k = jnp.asarray(gamma, jnp.float32).reshape(M, C_out, 1)
    beta_k = jnp.asarray(beta, jnp.float32).reshape(M, C_out, 1)
    w1_k = jnp.asarray(w1, jnp.float32)
    b1_k = jnp.asarray(b1, jnp.float32).reshape(d, 1)
    w2_k = jnp.asarray(w2, jnp.float32).reshape(M, C_out, d)

    # Per-batch lane pooling / broadcast matrices and same-group channel mask.
    P = jnp.repeat(jnp.eye(BB, dtype=jnp.float32), L_out, axis=0)   # (BB*L_out, BB)
    PT = P.T                                                        # (BB, BB*L_out)
    gid = jnp.arange(C_out, dtype=jnp.int32) // (C_out // G)
    A = (gid[:, None] == gid[None, :]).astype(jnp.float32)          # (C_out, C_out)

    inv_n = 1.0 / float((C_out // G) * L_out)
    inv_lo = 1.0 / float(L_out)

    kernel = functools.partial(
        _sk_kernel, M=M, C_out=C_out, L_out=L_out, BB=BB,
        inv_n=inv_n, inv_lo=inv_lo, eps=eps)

    flops = int(nb * (2 * M * 3 * C_in * (BB * L) * (BB * L_out)      # gathers
                      + 2 * M * C_out * 3 * C_in * (BB * L_out)       # conv weights
                      + 2 * M * 6 * C_out * C_out * BB                # groupnorm stats
                      + 2 * BB * (d * C_out + M * C_out * d)))        # squeeze-excite
    transcendentals = int(nb * BB * C_out * (2 * M + 1))
    bytes_accessed = int(x_lanes.size * 2 + sel.size * 2 + w_wide.size * 2
                         + 4 * (gamma_k.size + beta_k.size + w1_k.size + b1_k.size
                                + w2_k.size + P.size + PT.size + A.size)
                         + 4 * C_out * B * L_out)

    out_flat = pl.pallas_call(
        kernel,
        out_shape=jax.ShapeDtypeStruct((C_out, B * L_out), jnp.float32),
        grid=(nb,),
        in_specs=[
            pl.BlockSpec((C_in, BB * L), lambda n: (0, n)),
            pl.BlockSpec((M, 3, BB * L, BB * L_out), lambda n: (0, 0, 0, 0)),
            pl.BlockSpec((M, C_out, 3 * C_in), lambda n: (0, 0, 0)),
            pl.BlockSpec((M, C_out, 1), lambda n: (0, 0, 0)),
            pl.BlockSpec((M, C_out, 1), lambda n: (0, 0, 0)),
            pl.BlockSpec((d, C_out), lambda n: (0, 0)),
            pl.BlockSpec((d, 1), lambda n: (0, 0)),
            pl.BlockSpec((M, C_out, d), lambda n: (0, 0, 0)),
            pl.BlockSpec((BB * L_out, BB), lambda n: (0, 0)),
            pl.BlockSpec((BB, BB * L_out), lambda n: (0, 0)),
            pl.BlockSpec((C_out, C_out), lambda n: (0, 0)),
        ],
        out_specs=pl.BlockSpec((C_out, BB * L_out), lambda n: (0, n)),
        compiler_params=pltpu.CompilerParams(
            dimension_semantics=("parallel",)),
        cost_estimate=pl.CostEstimate(flops=flops,
                                      transcendentals=transcendentals,
                                      bytes_accessed=bytes_accessed),
    )(x_lanes, sel, w_wide, gamma_k, beta_k, w1_k, b1_k, w2_k, P, PT, A)

    # Layout plumbing back to PyTorch NCL (done outside the kernel).
    return out_flat.reshape(C_out, B, L_out).transpose(1, 0, 2)


def sk_conv_ref(x, wconv, gamma, beta, w1, b1, w2, *, stride=2, num_groups=10,
                eps=1e-5):
    """Pure-JAX reference matching the PyTorch forward."""
    B, C_in, L = x.shape
    M, C_out, _, _ = wconv.shape
    G = num_groups
    Cg = C_out // G
    outs = []
    for i in range(M):
        dil, pad = 1 + i, 1 + i
        y = lax.conv_general_dilated(
            x, wconv[i], window_strides=(stride,), padding=[(pad, pad)],
            rhs_dilation=(dil,), dimension_numbers=("NCH", "OIH", "NCH"),
            precision=lax.Precision.HIGHEST)
        Lo = y.shape[-1]
        yg = y.reshape(B, G, Cg, Lo)
        mean = yg.mean(axis=(2, 3), keepdims=True)
        var = yg.var(axis=(2, 3), keepdims=True)
        yn = ((yg - mean) / jnp.sqrt(var + eps)).reshape(B, C_out, Lo)
        yn = yn * gamma[i].reshape(1, C_out, 1) + beta[i].reshape(1, C_out, 1)
        outs.append(jnp.maximum(yn, 0.0))
    stacked = jnp.stack(outs, axis=1)                       # (B, M, C_out, Lo)
    U = stacked.sum(axis=1)
    s = U.mean(axis=2, keepdims=True)                       # (B, C_out, 1)
    z = jnp.maximum(jnp.einsum("dc,bcl->bdl", w1, s) + b1.reshape(1, -1, 1), 0.0)
    a = jnp.einsum("mcd,bdl->bmcl", w2.reshape(M, C_out, -1), z)
    att = jax.nn.softmax(a, axis=1)
    return (att * stacked).sum(axis=1)


if __name__ == "__main__":
    # Shapes consistent with SKConv(in_channels=16, out_channels=20, stride=2,
    # M=2, r=8, L=4, num_groups=10)  ->  d = max(16 // 8, 4) = 4
    B, C_in, L = 2, 16, 16
    C_out, M, stride, G = 20, 2, 2, 10
    d = max(C_in // 8, 4)

    key = jax.random.PRNGKey(0)
    k = jax.random.split(key, 5)
    x = jax.random.normal(k[0], (B, C_in, L), jnp.float32)

    # Conv weights ~ N(0, 0.01) as in init_weights; only fc1 has a bias.
    wconv = 0.01 * jax.random.normal(k[1], (M, C_out, C_in, 3), jnp.float32)
    gamma = jnp.ones((M, C_out), jnp.float32)               # GroupNorm affine defaults
    beta = jnp.zeros((M, C_out), jnp.float32)
    w1 = 0.01 * jax.random.normal(k[2], (d, C_out), jnp.float32)
    b1 = 0.1 * jax.random.normal(k[3], (d,), jnp.float32)
    w2 = 0.01 * jax.random.normal(k[4], (M * C_out, d), jnp.float32)

    out = jax.block_until_ready(
        sk_conv(x, wconv, gamma, beta, w1, b1, w2, stride=stride, num_groups=G))
    ref = sk_conv_ref(x, wconv, gamma, beta, w1, b1, w2, stride=stride,
                      num_groups=G)

    assert out.shape == (B, C_out, (L - 1) // stride + 1), out.shape
    assert bool(jnp.all(jnp.isfinite(out)))
    err = float(jnp.max(jnp.abs(out - ref)))
    assert err < 5e-2, f"mismatch vs reference: max abs err = {err}"
    print("KERNEL_OK")
</pallas_src>

<mosaic_0001>
module attributes {stable_mosaic.version = 11 : i64} {
  func.func @_sk_kernel(%arg0: i32, %arg1: memref<16x32xbf16, #tpu.memory_space<vmem>>, %arg2: memref<2x3x32x16xbf16, #tpu.memory_space<vmem>>, %arg3: memref<2x20x48xbf16, #tpu.memory_space<vmem>>, %arg4: memref<2x20x1xf32, #tpu.memory_space<vmem>>, %arg5: memref<2x20x1xf32, #tpu.memory_space<vmem>>, %arg6: memref<4x20xf32, #tpu.memory_space<vmem>>, %arg7: memref<4x1xf32, #tpu.memory_space<vmem>>, %arg8: memref<2x20x4xf32, #tpu.memory_space<vmem>>, %arg9: memref<16x2xf32, #tpu.memory_space<vmem>>, %arg10: memref<2x16xf32, #tpu.memory_space<vmem>>, %arg11: memref<20x20xf32, #tpu.memory_space<vmem>>, %arg12: memref<20x16xf32, #tpu.memory_space<vmem>>) attributes {dimension_semantics = [#tpu.dimension_semantics<parallel>], iteration_bounds = array<i64: 1>, scalar_prefetch = 0 : i64, scratch_operands = 0 : i64, tpu.core_type = #tpu.core_type<tc>, window_params = [{transform_indices = @transform_0, window_bounds = array<i64: 16, 32>}, {pipeline_mode = #tpu.pipeline_mode<synchronous>, transform_indices = @transform_1, window_bounds = array<i64: 2, 3, 32, 16>}, {pipeline_mode = #tpu.pipeline_mode<synchronous>, transform_indices = @transform_2, window_bounds = array<i64: 2, 20, 48>}, {pipeline_mode = #tpu.pipeline_mode<synchronous>, transform_indices = @transform_3, window_bounds = array<i64: 2, 20, 1>}, {pipeline_mode = #tpu.pipeline_mode<synchronous>, transform_indices = @transform_4, window_bounds = array<i64: 2, 20, 1>}, {pipeline_mode = #tpu.pipeline_mode<synchronous>, transform_indices = @transform_5, window_bounds = array<i64: 4, 20>}, {pipeline_mode = #tpu.pipeline_mode<synchronous>, transform_indices = @transform_6, window_bounds = array<i64: 4, 1>}, {pipeline_mode = #tpu.pipeline_mode<synchronous>, transform_indices = @transform_7, window_bounds = array<i64: 2, 20, 4>}, {pipeline_mode = #tpu.pipeline_mode<synchronous>, transform_indices = @transform_8, window_bounds = array<i64: 16, 2>}, {pipeline_mode = #tpu.pipeline_mode<synchronous>, transform_indices = @transform_9, window_bounds = array<i64: 2, 16>}, {pipeline_mode = #tpu.pipeline_mode<synchronous>, transform_indices = @transform_10, window_bounds = array<i64: 20, 20>}, {transform_indices = @transform_11, window_bounds = array<i64: 20, 16>}]} {
    %c0 = arith.constant 0 : index
    %c0_0 = arith.constant 0 : index
    %0 = vector.load %arg1[%c0, %c0_0] : memref<16x32xbf16, #tpu.memory_space<vmem>>, vector<16x32xbf16>
    %c0_1 = arith.constant 0 : index
    %c0_2 = arith.constant 0 : index
    %1 = vector.load %arg9[%c0_1, %c0_2] : memref<16x2xf32, #tpu.memory_space<vmem>>, vector<16x2xf32>
    %c0_3 = arith.constant 0 : index
    %c0_4 = arith.constant 0 : index
    %2 = vector.load %arg10[%c0_3, %c0_4] : memref<2x16xf32, #tpu.memory_space<vmem>>, vector<2x16xf32>
    %c0_5 = arith.constant 0 : index
    %c0_6 = arith.constant 0 : index
    %3 = vector.load %arg11[%c0_5, %c0_6] : memref<20x20xf32, #tpu.memory_space<vmem>>, vector<20x20xf32>
    %c0_7 = arith.constant 0 : index
    %c1 = arith.constant 1 : index
    %c0_8 = arith.constant 0 : index
    %c0_9 = arith.constant 0 : index
    %4 = vector.load %arg2[%c0_7, %c1, %c0_8, %c0_9] : memref<2x3x32x16xbf16, #tpu.memory_space<vmem>>, vector<1x1x32x16xbf16>
    %5 = vector.shape_cast %4 : vector<1x1x32x16xbf16> to vector<32x16xbf16>
    %cst = arith.constant dense<0.000000e+00> : vector<16x16xf32>
    %6 = tpu.matmul %0, %5, %cst {dimension_numbers = #tpu.dot_dimension_numbers<[1], [0], [0], [1], [0, 0, 1, 1], [], []>} : vector<16x32xbf16>, vector<32x16xbf16>, vector<16x16xf32> -> vector<16x16xf32>
    %7 = arith.truncf %6 : vector<16x16xf32> to vector<16x16xbf16>
    %c0_10 = arith.constant 0 : index
    %c0_11 = arith.constant 0 : index
    %c0_12 = arith.constant 0 : index
    %c0_13 = arith.constant 0 : index
    %8 = vector.load %arg2[%c0_10, %c0_11, %c0_12, %c0_13] : memref<2x3x32x16xbf16, #tpu.memory_space<vmem>>, vector<1x1x32x16xbf16>
    %9 = vector.shape_cast %8 : vector<1x1x32x16xbf16> to vector<32x16xbf16>
    %cst_14 = arith.constant dense<0.000000e+00> : vector<16x16xf32>
    %10 = tpu.matmul %0, %9, %cst_14 {dimension_numbers = #tpu.dot_dimension_numbers<[1], [0], [0], [1], [0, 0, 1, 1], [], []>} : vector<16x32xbf16>, vector<32x16xbf16>, vector<16x16xf32> -> vector<16x16xf32>
    %11 = arith.truncf %10 : vector<16x16xf32> to vector<16x16xbf16>
    %c0_15 = arith.constant 0 : index
    %c2 = arith.constant 2 : index
    %c0_16 = arith.constant 0 : index
    %c0_17 = arith.constant 0 : index
    %12 = vector.load %arg2[%c0_15, %c2, %c0_16, %c0_17] : memref<2x3x32x16xbf16, #tpu.memory_space<vmem>>, vector<1x1x32x16xbf16>
    %13 = vector.shape_cast %12 : vector<1x1x32x16xbf16> to vector<32x16xbf16>
    %cst_18 = arith.constant dense<0.000000e+00> : vector<16x16xf32>
    %14 = tpu.matmul %0, %13, %cst_18 {dimension_numbers = #tpu.dot_dimension_numbers<[1], [0], [0], [1], [0, 0, 1, 1], [], []>} : vector<16x32xbf16>, vector<32x16xbf16>, vector<16x16xf32> -> vector<16x16xf32>
    %15 = arith.truncf %14 : vector<16x16xf32> to vector<16x16xbf16>
    %16 = tpu.concatenate %11, %7, %15 in 0 : vector<16x16xbf16>, vector<16x16xbf16>, vector<16x16xbf16> -> vector<48x16xbf16>
    %c0_19 = arith.constant 0 : index
    %c0_20 = arith.constant 0 : index
    %c0_21 = arith.constant 0 : index
    %17 = vector.load %arg3[%c0_19, %c0_20, %c0_21] : memref<2x20x48xbf16, #tpu.memory_space<vmem>>, vector<1x20x48xbf16>
    %18 = vector.shape_cast %17 : vector<1x20x48xbf16> to vector<20x48xbf16>
    %cst_22 = arith.constant dense<0.000000e+00> : vector<20x16xf32>
    %19 = tpu.matmul %18, %16, %cst_22 {dimension_numbers = #tpu.dot_dimension_numbers<[1], [0], [0], [1], [0, 0, 1, 1], [], []>} : vector<20x48xbf16>, vector<48x16xbf16>, vector<20x16xf32> -> vector<20x16xf32>
    %cst_23 = arith.constant dense<0.000000e+00> : vector<20x2xf32>
    %20 = tpu.matmul %19, %1, %cst_23 {dimension_numbers = #tpu.dot_dimension_numbers<[1], [0], [0], [1], [0, 0, 1, 1], [], []>} : vector<20x16xf32>, vector<16x2xf32>, vector<20x2xf32> -> vector<20x2xf32>
    %21 = arith.mulf %19, %19 : vector<20x16xf32>
    %cst_24 = arith.constant dense<0.000000e+00> : vector<20x2xf32>
    %22 = tpu.matmul %21, %1, %cst_24 {dimension_numbers = #tpu.dot_dimension_numbers<[1], [0], [0], [1], [0, 0, 1, 1], [], []>} : vector<20x16xf32>, vector<16x2xf32>, vector<20x2xf32> -> vector<20x2xf32>
    %cst_25 = arith.constant dense<0.000000e+00> : vector<20x2xf32>
    %23 = tpu.matmul %3, %20, %cst_25 {dimension_numbers = #tpu.dot_dimension_numbers<[1], [0], [0], [1], [0, 0, 1, 1], [], []>} : vector<20x20xf32>, vector<20x2xf32>, vector<20x2xf32> -> vector<20x2xf32>
    %cst_26 = arith.constant 6.250000e-02 : f32
    %24 = vector.broadcast %cst_26 : f32 to vector<20x2xf32>
    %25 = arith.mulf %23, %24 : vector<20x2xf32>
    %cst_27 = arith.constant dense<0.000000e+00> : vector<20x2xf32>
    %26 = tpu.matmul %3, %22, %cst_27 {dimension_numbers = #tpu.dot_dimension_numbers<[1], [0], [0], [1], [0, 0, 1, 1], [], []>} : vector<20x20xf32>, vector<20x2xf32>, vector<20x2xf32> -> vector<20x2xf32>
    %cst_28 = arith.constant 6.250000e-02 : f32
    %27 = vector.broadcast %cst_28 : f32 to vector<20x2xf32>
    %28 = arith.mulf %26, %27 : vector<20x2xf32>
    %29 = arith.mulf %25, %25 : vector<20x2xf32>
    %30 = arith.subf %28, %29 : vector<20x2xf32>
    %cst_29 = arith.constant 0.000000e+00 : f32
    %31 = vector.broadcast %cst_29 : f32 to vector<20x2xf32>
    %32 = arith.maximumf %30, %31 : vector<20x2xf32>
    %cst_30 = arith.constant 9.99999974E-6 : f32
    %33 = vector.broadcast %cst_30 : f32 to vector<20x2xf32>
    %34 = arith.addf %32, %33 : vector<20x2xf32>
    %35 = math.rsqrt %34 : vector<20x2xf32>
    %cst_31 = arith.constant dense<0.000000e+00> : vector<20x16xf32>
    %36 = tpu.matmul %25, %2, %cst_31 {dimension_numbers = #tpu.dot_dimension_numbers<[1], [0], [0], [1], [0, 0, 1, 1], [], []>} : vector<20x2xf32>, vector<2x16xf32>, vector<20x16xf32> -> vector<20x16xf32>
    %cst_32 = arith.constant dense<0.000000e+00> : vector<20x16xf32>
    %37 = tpu.matmul %35, %2, %cst_32 {dimension_numbers = #tpu.dot_dimension_numbers<[1], [0], [0], [1], [0, 0, 1, 1], [], []>} : vector<20x2xf32>, vector<2x16xf32>, vector<20x16xf32> -> vector<20x16xf32>
    %38 = arith.subf %19, %36 : vector<20x16xf32>
    %39 = arith.mulf %38, %37 : vector<20x16xf32>
    %c0_33 = arith.constant 0 : index
    %c0_34 = arith.constant 0 : index
    %c0_35 = arith.constant 0 : index
    %40 = vector.load %arg4[%c0_33, %c0_34, %c0_35] : memref<2x20x1xf32, #tpu.memory_space<vmem>>, vector<1x20x1xf32>
    %41 = vector.shape_cast %40 : vector<1x20x1xf32> to vector<20x1xf32>
    %42 = vector.broadcast %41 : vector<20x1xf32> to vector<20x16xf32>
    %43 = arith.mulf %39, %42 : vector<20x16xf32>
    %c0_36 = arith.constant 0 : index
    %c0_37 = arith.constant 0 : index
    %c0_38 = arith.constant 0 : index
    %44 = vector.load %arg5[%c0_36, %c0_37, %c0_38] : memref<2x20x1xf32, #tpu.memory_space<vmem>>, vector<1x20x1xf32>
    %45 = vector.shape_cast %44 : vector<1x20x1xf32> to vector<20x1xf32>
    %46 = vector.broadcast %45 : vector<20x1xf32> to vector<20x16xf32>
    %47 = arith.addf %43, %46 : vector<20x16xf32>
    %cst_39 = arith.constant 0.000000e+00 : f32
    %48 = vector.broadcast %cst_39 : f32 to vector<20x16xf32>
    %49 = arith.maximumf %47, %48 : vector<20x16xf32>
    %c1_40 = arith.constant 1 : index
    %c0_41 = arith.constant 0 : index
    %c0_42 = arith.constant 0 : index
    %c0_43 = arith.constant 0 : index
    %50 = vector.load %arg2[%c1_40, %c0_41, %c0_42, %c0_43] : memref<2x3x32x16xbf16, #tpu.memory_space<vmem>>, vector<1x1x32x16xbf16>
    %51 = vector.shape_cast %50 : vector<1x1x32x16xbf16> to vector<32x16xbf16>
    %cst_44 = arith.constant dense<0.000000e+00> : vector<16x16xf32>
    %52 = tpu.matmul %0, %51, %cst_44 {dimension_numbers = #tpu.dot_dimension_numbers<[1], [0], [0], [1], [0, 0, 1, 1], [], []>} : vector<16x32xbf16>, vector<32x16xbf16>, vector<16x16xf32> -> vector<16x16xf32>
    %53 = arith.truncf %52 : vector<16x16xf32> to vector<16x16xbf16>
    %c1_45 = arith.constant 1 : index
    %c2_46 = arith.constant 2 : index
    %c0_47 = arith.constant 0 : index
    %c0_48 = arith.constant 0 : index
    %54 = vector.load %arg2[%c1_45, %c2_46, %c0_47, %c0_48] : memref<2x3x32x16xbf16, #tpu.memory_space<vmem>>, vector<1x1x32x16xbf16>
    %55 = vector.shape_cast %54 : vector<1x1x32x16xbf16> to vector<32x16xbf16>
    %cst_49 = arith.constant dense<0.000000e+00> : vector<16x16xf32>
    %56 = tpu.matmul %0, %55, %cst_49 {dimension_numbers = #tpu.dot_dimension_numbers<[1], [0], [0], [1], [0, 0, 1, 1], [], []>} : vector<16x32xbf16>, vector<32x16xbf16>, vector<16x16xf32> -> vector<16x16xf32>
    %57 = arith.truncf %56 : vector<16x16xf32> to vector<16x16xbf16>
    %58 = tpu.concatenate %53, %7, %57 in 0 : vector<16x16xbf16>, vector<16x16xbf16>, vector<16x16xbf16> -> vector<48x16xbf16>
    %c1_50 = arith.constant 1 : index
    %c0_51 = arith.constant 0 : index
    %c0_52 = arith.constant 0 : index
    %59 = vector.load %arg3[%c1_50, %c0_51, %c0_52] : memref<2x20x48xbf16, #tpu.memory_space<vmem>>, vector<1x20x48xbf16>
    %60 = vector.shape_cast %59 : vector<1x20x48xbf16> to vector<20x48xbf16>
    %cst_53 = arith.constant dense<0.000000e+00> : vector<20x16xf32>
    %61 = tpu.matmul %60, %58, %cst_53 {dimension_numbers = #tpu.dot_dimension_numbers<[1], [0], [0], [1], [0, 0, 1, 1], [], []>} : vector<20x48xbf16>, vector<48x16xbf16>, vector<20x16xf32> -> vector<20x16xf32>
    %cst_54 = arith.constant dense<0.000000e+00> : vector<20x2xf32>
    %62 = tpu.matmul %61, %1, %cst_54 {dimension_numbers = #tpu.dot_dimension_numbers<[1], [0], [0], [1], [0, 0, 1, 1], [], []>} : vector<20x16xf32>, vector<16x2xf32>, vector<20x2xf32> -> vector<20x2xf32>
    %63 = arith.mulf %61, %61 : vector<20x16xf32>
    %cst_55 = arith.constant dense<0.000000e+00> : vector<20x2xf32>
    %64 = tpu.matmul %63, %1, %cst_55 {dimension_numbers = #tpu.dot_dimension_numbers<[1], [0], [0], [1], [0, 0, 1, 1], [], []>} : vector<20x16xf32>, vector<16x2xf32>, vector<20x2xf32> -> vector<20x2xf32>
    %cst_56 = arith.constant dense<0.000000e+00> : vector<20x2xf32>
    %65 = tpu.matmul %3, %62, %cst_56 {dimension_numbers = #tpu.dot_dimension_numbers<[1], [0], [0], [1], [0, 0, 1, 1], [], []>} : vector<20x20xf32>, vector<20x2xf32>, vector<20x2xf32> -> vector<20x2xf32>
    %cst_57 = arith.constant 6.250000e-02 : f32
    %66 = vector.broadcast %cst_57 : f32 to vector<20x2xf32>
    %67 = arith.mulf %65, %66 : vector<20x2xf32>
    %cst_58 = arith.constant dense<0.000000e+00> : vector<20x2xf32>
    %68 = tpu.matmul %3, %64, %cst_58 {dimension_numbers = #tpu.dot_dimension_numbers<[1], [0], [0], [1], [0, 0, 1, 1], [], []>} : vector<20x20xf32>, vector<20x2xf32>, vector<20x2xf32> -> vector<20x2xf32>
    %cst_59 = arith.constant 6.250000e-02 : f32
    %69 = vector.broadcast %cst_59 : f32 to vector<20x2xf32>
    %70 = arith.mulf %68, %69 : vector<20x2xf32>
    %71 = arith.mulf %67, %67 : vector<20x2xf32>
    %72 = arith.subf %70, %71 : vector<20x2xf32>
    %cst_60 = arith.constant 0.000000e+00 : f32
    %73 = vector.broadcast %cst_60 : f32 to vector<20x2xf32>
    %74 = arith.maximumf %72, %73 : vector<20x2xf32>
    %cst_61 = arith.constant 9.99999974E-6 : f32
    %75 = vector.broadcast %cst_61 : f32 to vector<20x2xf32>
    %76 = arith.addf %74, %75 : vector<20x2xf32>
    %77 = math.rsqrt %76 : vector<20x2xf32>
    %cst_62 = arith.constant dense<0.000000e+00> : vector<20x16xf32>
    %78 = tpu.matmul %67, %2, %cst_62 {dimension_numbers = #tpu.dot_dimension_numbers<[1], [0], [0], [1], [0, 0, 1, 1], [], []>} : vector<20x2xf32>, vector<2x16xf32>, vector<20x16xf32> -> vector<20x16xf32>
    %cst_63 = arith.constant dense<0.000000e+00> : vector<20x16xf32>
    %79 = tpu.matmul %77, %2, %cst_63 {dimension_numbers = #tpu.dot_dimension_numbers<[1], [0], [0], [1], [0, 0, 1, 1], [], []>} : vector<20x2xf32>, vector<2x16xf32>, vector<20x16xf32> -> vector<20x16xf32>
    %80 = arith.subf %61, %78 : vector<20x16xf32>
    %81 = arith.mulf %80, %79 : vector<20x16xf32>
    %c1_64 = arith.constant 1 : index
    %c0_65 = arith.constant 0 : index
    %c0_66 = arith.constant 0 : index
    %82 = vector.load %arg4[%c1_64, %c0_65, %c0_66] : memref<2x20x1xf32, #tpu.memory_space<vmem>>, vector<1x20x1xf32>
    %83 = vector.shape_cast %82 : vector<1x20x1xf32> to vector<20x1xf32>
    %84 = vector.broadcast %83 : vector<20x1xf32> to vector<20x16xf32>
    %85 = arith.mulf %81, %84 : vector<20x16xf32>
    %c1_67 = arith.constant 1 : index
    %c0_68 = arith.constant 0 : index
    %c0_69 = arith.constant 0 : index
    %86 = vector.load %arg5[%c1_67, %c0_68, %c0_69] : memref<2x20x1xf32, #tpu.memory_space<vmem>>, vector<1x20x1xf32>
    %87 = vector.shape_cast %86 : vector<1x20x1xf32> to vector<20x1xf32>
    %88 = vector.broadcast %87 : vector<20x1xf32> to vector<20x16xf32>
    %89 = arith.addf %85, %88 : vector<20x16xf32>
    %cst_70 = arith.constant 0.000000e+00 : f32
    %90 = vector.broadcast %cst_70 : f32 to vector<20x16xf32>
    %91 = arith.maximumf %89, %90 : vector<20x16xf32>
    %92 = arith.addf %49, %91 : vector<20x16xf32>
    %cst_71 = arith.constant dense<0.000000e+00> : vector<20x2xf32>
    %93 = tpu.matmul %92, %1, %cst_71 {dimension_numbers = #tpu.dot_dimension_numbers<[1], [0], [0], [1], [0, 0, 1, 1], [], []>} : vector<20x16xf32>, vector<16x2xf32>, vector<20x2xf32> -> vector<20x2xf32>
    %cst_72 = arith.constant 1.250000e-01 : f32
    %94 = vector.broadcast %cst_72 : f32 to vector<20x2xf32>
    %95 = arith.mulf %93, %94 : vector<20x2xf32>
    %c0_73 = arith.constant 0 : index
    %c0_74 = arith.constant 0 : index
    %96 = vector.load %arg6[%c0_73, %c0_74] : memref<4x20xf32, #tpu.memory_space<vmem>>, vector<4x20xf32>
    %cst_75 = arith.constant dense<0.000000e+00> : vector<4x2xf32>
    %97 = tpu.matmul %96, %95, %cst_75 {dimension_numbers = #tpu.dot_dimension_numbers<[1], [0], [0], [1], [0, 0, 1, 1], [], []>} : vector<4x20xf32>, vector<20x2xf32>, vector<4x2xf32> -> vector<4x2xf32>
    %c0_76 = arith.constant 0 : index
    %c0_77 = arith.constant 0 : index
    %98 = vector.load %arg7[%c0_76, %c0_77] : memref<4x1xf32, #tpu.memory_space<vmem>>, vector<4x1xf32>
    %99 = vector.broadcast %98 : vector<4x1xf32> to vector<4x2xf32>
    %100 = arith.addf %97, %99 : vector<4x2xf32>
    %cst_78 = arith.constant 0.000000e+00 : f32
    %101 = vector.broadcast %cst_78 : f32 to vector<4x2xf32>
    %102 = arith.maximumf %100, %101 : vector<4x2xf32>
    %c0_79 = arith.constant 0 : index
    %c0_80 = arith.constant 0 : index
    %c0_81 = arith.constant 0 : index
    %103 = vector.load %arg8[%c0_79, %c0_80, %c0_81] : memref<2x20x4xf32, #tpu.memory_space<vmem>>, vector<1x20x4xf32>
    %104 = vector.shape_cast %103 : vector<1x20x4xf32> to vector<20x4xf32>
    %cst_82 = arith.constant dense<0.000000e+00> : vector<20x2xf32>
    %105 = tpu.matmul %104, %102, %cst_82 {dimension_numbers = #tpu.dot_dimension_numbers<[1], [0], [0], [1], [0, 0, 1, 1], [], []>} : vector<20x4xf32>, vector<4x2xf32>, vector<20x2xf32> -> vector<20x2xf32>
    %c1_83 = arith.constant 1 : index
    %c0_84 = arith.constant 0 : index
    %c0_85 = arith.constant 0 : index
    %106 = vector.load %arg8[%c1_83, %c0_84, %c0_85] : memref<2x20x4xf32, #tpu.memory_space<vmem>>, vector<1x20x4xf32>
    %107 = vector.shape_cast %106 : vector<1x20x4xf32> to vector<20x4xf32>
    %cst_86 = arith.constant dense<0.000000e+00> : vector<20x2xf32>
    %108 = tpu.matmul %107, %102, %cst_86 {dimension_numbers = #tpu.dot_dimension_numbers<[1], [0], [0], [1], [0, 0, 1, 1], [], []>} : vector<20x4xf32>, vector<4x2xf32>, vector<20x2xf32> -> vector<20x2xf32>
    %109 = arith.maximumf %105, %108 : vector<20x2xf32>
    %110 = arith.subf %105, %109 : vector<20x2xf32>
    %111 = math.exp %110 : vector<20x2xf32>
    %112 = arith.subf %108, %109 : vector<20x2xf32>
    %113 = math.exp %112 : vector<20x2xf32>
    %114 = arith.addf %111, %113 : vector<20x2xf32>
    %115 = tpu.reciprocal %114 {approx = true} : vector<20x2xf32> -> vector<20x2xf32>
    %cst_87 = arith.constant 0.000000e+00 : f32
    %116 = vector.broadcast %cst_87 : f32 to vector<20x16xf32>
    %117 = arith.mulf %111, %115 : vector<20x2xf32>
    %cst_88 = arith.constant dense<0.000000e+00> : vector<20x16xf32>
    %118 = tpu.matmul %117, %2, %cst_88 {dimension_numbers = #tpu.dot_dimension_numbers<[1], [0], [0], [1], [0, 0, 1, 1], [], []>} : vector<20x2xf32>, vector<2x16xf32>, vector<20x16xf32> -> vector<20x16xf32>
    %119 = arith.mulf %118, %49 : vector<20x16xf32>
    %120 = arith.addf %116, %119 : vector<20x16xf32>
    %121 = arith.mulf %113, %115 : vector<20x2xf32>
    %cst_89 = arith.constant dense<0.000000e+00> : vector<20x16xf32>
    %122 = tpu.matmul %121, %2, %cst_89 {dimension_numbers = #tpu.dot_dimension_numbers<[1], [0], [0], [1], [0, 0, 1, 1], [], []>} : vector<20x2xf32>, vector<2x16xf32>, vector<20x16xf32> -> vector<20x16xf32>
    %123 = arith.mulf %122, %91 : vector<20x16xf32>
    %124 = arith.addf %120, %123 : vector<20x16xf32>
    %c0_90 = arith.constant 0 : index
    %c0_91 = arith.constant 0 : index
    %125 = vector.load %arg12[%c0_90, %c0_91] : memref<20x16xf32, #tpu.memory_space<vmem>>, vector<20x16xf32>
    tpu.vector_store %arg12[%c0_90, %c0_91], %124 {strides = array<i32>} : memref<20x16xf32, #tpu.memory_space<vmem>>, vector<20x16xf32>,
    return
  }
  func.func @transform_0(%arg0: i32) -> (i32, i32) {
    %c0_i32 = arith.constant 0 : i32
    %c0_i32_0 = arith.constant 0 : i32
    return %c0_i32, %arg0 : i32, i32
  }
  func.func @transform_1(%arg0: i32) -> (i32, i32, i32, i32) {
    %c0_i32 = arith.constant 0 : i32
    %c0_i32_0 = arith.constant 0 : i32
    %c0_i32_1 = arith.constant 0 : i32
    %c0_i32_2 = arith.constant 0 : i32
    %c0_i32_3 = arith.constant 0 : i32
    return %c0_i32, %c0_i32_0, %c0_i32_1, %c0_i32_2 : i32, i32, i32, i32
  }
  func.func @transform_2(%arg0: i32) -> (i32, i32, i32) {
    %c0_i32 = arith.constant 0 : i32
    %c0_i32_0 = arith.constant 0 : i32
    %c0_i32_1 = arith.constant 0 : i32
    %c0_i32_2 = arith.constant 0 : i32
    return %c0_i32, %c0_i32_0, %c0_i32_1 : i32, i32, i32
  }
  func.func @transform_3(%arg0: i32) -> (i32, i32, i32) {
    %c0_i32 = arith.constant 0 : i32
    %c0_i32_0 = arith.constant 0 : i32
    %c0_i32_1 = arith.constant 0 : i32
    %c0_i32_2 = arith.constant 0 : i32
    return %c0_i32, %c0_i32_0, %c0_i32_1 : i32, i32, i32
  }
  func.func @transform_4(%arg0: i32) -> (i32, i32, i32) {
    %c0_i32 = arith.constant 0 : i32
    %c0_i32_0 = arith.constant 0 : i32
    %c0_i32_1 = arith.constant 0 : i32
    %c0_i32_2 = arith.constant 0 : i32
    return %c0_i32, %c0_i32_0, %c0_i32_1 : i32, i32, i32
  }
  func.func @transform_5(%arg0: i32) -> (i32, i32) {
    %c0_i32 = arith.constant 0 : i32
    %c0_i32_0 = arith.constant 0 : i32
    %c0_i32_1 = arith.constant 0 : i32
    return %c0_i32, %c0_i32_0 : i32, i32
  }
  func.func @transform_6(%arg0: i32) -> (i32, i32) {
    %c0_i32 = arith.constant 0 : i32
    %c0_i32_0 = arith.constant 0 : i32
    %c0_i32_1 = arith.constant 0 : i32
    return %c0_i32, %c0_i32_0 : i32, i32
  }
  func.func @transform_7(%arg0: i32) -> (i32, i32, i32) {
    %c0_i32 = arith.constant 0 : i32
    %c0_i32_0 = arith.constant 0 : i32
    %c0_i32_1 = arith.constant 0 : i32
    %c0_i32_2 = arith.constant 0 : i32
    return %c0_i32, %c0_i32_0, %c0_i32_1 : i32, i32, i32
  }
  func.func @transform_8(%arg0: i32) -> (i32, i32) {
    %c0_i32 = arith.constant 0 : i32
    %c0_i32_0 = arith.constant 0 : i32
    %c0_i32_1 = arith.constant 0 : i32
    return %c0_i32, %c0_i32_0 : i32, i32
  }
  func.func @transform_9(%arg0: i32) -> (i32, i32) {
    %c0_i32 = arith.constant 0 : i32
    %c0_i32_0 = arith.constant 0 : i32
    %c0_i32_1 = arith.constant 0 : i32
    return %c0_i32, %c0_i32_0 : i32, i32
  }
  func.func @transform_10(%arg0: i32) -> (i32, i32) {
    %c0_i32 = arith.constant 0 : i32
    %c0_i32_0 = arith.constant 0 : i32
    %c0_i32_1 = arith.constant 0 : i32
    return %c0_i32, %c0_i32_0 : i32, i32
  }
  func.func @transform_11(%arg0: i32) -> (i32, i32) {
    %c0_i32 = arith.constant 0 : i32
    %c0_i32_0 = arith.constant 0 : i32
    return %c0_i32, %arg0 : i32, i32
  }
}

</mosaic_0001>

<bundles_post_ra>
// kernel: tpu_custom_call.1
= control target key start
LH: loop header
LB: loop body
LE: loop exit
PB: predicated region body
PF: predicated region fallthrough
CT: control target
= control target key end

     0   :  { %v2884_v0 = vmov 0.0   ;;  %vm2885_vm0 = vmmov 0   ;;  %vm69_vm1 = vcmask 261120   ;;  %vm243_vm2 = vcmask 392192   ;;  %s3436_s1 = inlined_call_operand.vmem [shape: bf16[2,3,32,16], index: 1, kind: input, shape index: {}]   ;;  %s3437_s0 = inlined_call_operand.vmem [shape: bf16[16,32], index: 0, kind: input, shape index: {}]   ;;  %s3438_s2 = inlined_call_operand.vmem [shape: bf16[2,20,48], index: 2, kind: input, shape index: {}]   ;;  %s3439_s8 = inlined_call_operand.vmem [shape: f32[16,2], index: 8, kind: input, shape index: {}]   ;;  %s3440_s10 = inlined_call_operand.vmem [shape: f32[20,20], index: 10, kind: input, shape index: {}]   ;;  %s3441_s9 = inlined_call_operand.vmem [shape: f32[2,16], index: 9, kind: input, shape index: {}]   ;;  %s3442_s3 = inlined_call_operand.vmem [shape: f32[2,20,1], index: 3, kind: input, shape index: {}]   ;;  %s3443_s4 = inlined_call_operand.vmem [shape: f32[2,20,1], index: 4, kind: input, shape index: {}]   ;;  %s3444_s6 = inlined_call_operand.vmem [shape: f32[4,1], index: 6, kind: input, shape index: {}]   ;;  %s3445_s5 = inlined_call_operand.vmem [shape: f32[4,20], index: 5, kind: input, shape index: {}]   ;;  %s3446_s7 = inlined_call_operand.vmem [shape: f32[2,20,4], index: 7, kind: input, shape index: {}]   ;;  %s3447_s11 = inlined_call_operand.vmem [shape: f32[20,16], index: 11, kind: output, shape index: {}]  }
   0x1   :  { %2521 = vmatprep.subr.bf16.mxu0 %v2884_v0  ;;  %2529 = vmatprep.subr.bf16.mxu1 %v2884_v0  ;;  %v2839_v1 = vld [vmem:[%s3436_s1 + $0x10] sm:$0xff]   ;;  %v2840_v2 = vld [vmem:[%s3436_s1] sm:$0xff]   ;;  %v2841_v3 = vld [vmem:[%s3436_s1 + $0x18] sm:$0xff]   ;;  %v2886_v9 = vmov 0.0|0.0   ;;  %vm298_vm3 = vcmask 130048   ;;  %vm490_vm4 = vcmask 1043456  }
   0x2   :  { %2525 = vmatprep.mubr.msk.bf16.mxu0 %vm2885_vm0, %v2884_v0  ;;  %2533 = vmatprep.mubr.msk.bf16.mxu1 %vm2885_vm0, %v2884_v0  ;;  %v2842_v4 = vld [vmem:[%s3436_s1 + $0x8] sm:$0xff]   ;;  %v2971_v5 = vld [vmem:[%s3437_s0] sm:$0xff]   ;;  %vm480_vm5 = vcmask 162816   ;;  %v3083_v52 = vld [vmem:[%s3440_s10 + $0x10] sm:$0xf]  ;;  %vm688_vm6 = vcmask 1041408  }
   0x3   :  { %2522 = vmatpush3.bf16.msra.mxu0 %v2839_v1  ;;  %2530 = vmatpush3.bf16.msra.mxu1 %v2840_v2  ;;  %v2844_v6 = vld [vmem:[%s3436_s1 + $0x20] sm:$0xff]   ;;  %v2845_v7 = vld [vmem:[%s3436_s1 + $0x28] sm:$0xff]   ;;  %v2887_v54 = vmov 0   ;;  %v2381_v57 = vld [vmem:[%s3442_s3 + $0x18] sm:$0xff]  ;;  %vm678_vm7 = vcmask 15360   ;;  %vm1877_vm8 = vcmask 31744  }
   0x4   :  { %2523 = vmatprep.subr.bf16.mxu0 %v2884_v0  ;;  %2531 = vmatprep.subr.bf16.mxu1 %v2884_v0  ;;  %v2846_v8 = vld [vmem:[%s3438_s2] sm:$0xff]   ;;  %v42_v11 = vld [vmem:[%s3439_s8 + $0x8] sm:$0xff]  ;;  %v869_v60 = vld [vmem:[%s3442_s3 + $0x10] sm:$0xf]  ;;  %vm2288_vm9 = vcmask 125952  }
   0x5   :  { %v41_v10 = vld [vmem:[%s3439_s8] sm:$0xff]  ;;  %v2847_v28 = vld [vmem:[%s3438_s2 + $0x8] ss:$0 sps:$4 sm:$0x33]   ;;  %2837 = vset.pattern.permute.xlu0 %v2887_v54  ;;  %2838 = vset.pattern.permute.xlu1 %v2887_v54  ;;  %v890_v61 = vld [vmem:[%s3443_s4 + $0x10] sm:$0xf] }
   0x6   :  { %v3002_v12 = vpack.c.bf16 %v42_v11, %v41_v10  ;;  %v3056_v48 = vld [vmem:[%s3440_s10] sm:$0xff]  ;;  %v3069_v51 = vld [vmem:[%s3440_s10 + $0x8] sm:$0xff]  ;;  %v2848_v63 = vld [vmem:[%s3436_s1 + $0x30] sm:$0xff]  }
   0x7   :  { %2524 = vmatpush3.bf16.msra.mxu0 %v2841_v3  ;;  %2532 = vmatpush3.bf16.msra.mxu1 %v2842_v4  ;;  %v3100_v53 = vld [vmem:[%s3441_s9] sm:$0x3]  ;;  %v868_v58 = vld [vmem:[%s3442_s3 + $0x8] sm:$0xff]  ;;  %v2849_v10 = vld [vmem:[%s3436_s1 + $0x38] sm:$0xff]  }
   0x8   :  { %2537 = vmatprep.subr.bf16.mxu0 %v2884_v0  ;;  %v867_v55 = vld [vmem:[%s3442_s3] sm:$0xff]  ;;  %v889_v59 = vld [vmem:[%s3443_s4 + $0x8] sm:$0xff] }
   0x9   :  { %872 = vperm.xlu0 %2837, %v867_v55   ;;  %v888_v56 = vld [vmem:[%s3443_s4] sm:$0xff] }
   0xa   :  { %2526 = vmatmul.mubr.msk.bf16.vlgmr.msra.gmra.mrb[0].mxu0 %vm69_vm1, %v2971_v5  ;;  %2534 = vmatmul.mubr.msk.bf16.vlgmr.msra.gmra.mrb[0].mxu1 %vm69_vm1, %v2971_v5 }
   0xb   :  { %2538 = vmatpush3.bf16.msra.mxu0 %v2844_v6  ;;  %2541 = vmatprep.mubr.msk.bf16.mxu0 %vm2885_vm0, %v2884_v0 }
   0xc   :  { %2539 = vmatprep.subr.bf16.mxu0 %v2884_v0  ;;  %2551 = vmatprep.mubr.msk.bf16.mxu1 %vm243_vm2, %v2846_v8 }
   0xd   :  { %893 = vperm.xlu1 %2838, %v888_v56   ;;  %1654 = vperm.xlu0 %2837, %v2381_v57  }
   0xf   :  { %2540 = vmatpush3.bf16.msra.mxu0 %v2845_v7 }
  0x10   :  { %2803 = vmatprep.subr.bf16.mxu0 %v2886_v9 }
  0x11   :  { %877 = vperm.xlu0 %2837, %v868_v58  }
  0x12   :  { %2542 = vmatmul.mubr.msk.bf16.vlgmr.msra.gmra.mrb[4].mxu0 %vm69_vm1, %v2971_v5 }
  0x13   :  { %2559 = vmatprep.mubr.msk.f32.mxu0 %vm2885_vm0, %v2884_v0  ;;  %2805 = vmatpush3.bf16.msra.mxu0 %v3002_v12 }
  0x14   :  { %2809 = vmatprep.subr.bf16.mxu0 %v2886_v9 }
  0x15   :  { %898 = vperm.xlu0 %2837, %v889_v59  }
  0x19   :  { %882 = vperm.xlu0 %2837, %v869_v60  }
  0x1d   :  { %903 = vperm.xlu0 %2837, %v890_v61  }
  0xdd   :  { %v107_v13 = vpop.f32.mrb[0].mxu0  ;;  %v165_v14 = vpop.f32.mrb[0].mxu1 }
  0xde   :  { %v2527_v15 = vpop.f32.mrb[1].mxu0  ;;  %v2535_v16 = vpop.f32.mrb[1].mxu1 }
  0xdf   :  { %v110_v17 = vpop.f32.mrb[2].mxu0  ;;  %v168_v19 = vpop.f32.mrb[2].mxu1 }
  0xe0   :  { %v3006_v18 = vpack.c.bf16 %v110_v17, %v107_v13  ;;  %v2528_v20 = vpop.f32.mrb[3].mxu0  ;;  %v172_v21 = vpack.c.bf16 %v168_v19, %v165_v14  ;;  %v2536_v22 = vpop.f32.mrb[3].mxu1 }
  0xe2   :  { %2545 = vmatprep.subr.bf16.mxu1 %v172_v21 }
  0xe3   :  { %2546 = vmatpush3.bf16.msra.mxu1 %v172_v21 }
  0xe4   :  { %2547 = vmatprep.subr.bf16.mxu1 %v3006_v18 }
  0xe5   :  { %v224_v23 = vpop.f32.mrb[4].mxu0 }
  0xe6   :  { %v2543_v24 = vpop.f32.mrb[5].mxu0 }
  0xe7   :  { %v227_v25 = vpop.f32.mrb[6].mxu0  ;;  %2548 = vmatpush3.bf16.msra.mxu1 %v3006_v18 }
  0xe8   :  { %v231_v26 = vpack.c.bf16 %v227_v25, %v224_v23  ;;  %v2544_v27 = vpop.f32.mrb[7].mxu0 }
  0xea   :  { %2549 = vmatprep.subr.bf16.mxu1 %v231_v26 }
  0xeb   :  { %2550 = vmatpush3.bf16.msra.mxu1 %v231_v26 }
  0xec   :  { %2806 = vmatprep.subr.bf16.mxu1 %v2886_v9 }
  0xee   :  { %2552 = vmatmul.mubr.msk.bf16.vlgmr.msra.gmra.mrb[4].mxu1 %vm243_vm2, %v2847_v28 }
  0xef   :  { %2808 = vmatpush3.bf16.msra.mxu1 %v3002_v12  ;;  %2572 = vmatprep.mubr.msk.f32.mxu1 %vm2885_vm0, %v2884_v0 }
  0xf0   :  { %2812 = vmatprep.subr.bf16.mxu1 %v2886_v9 }
 0x1c1   :  { %v3019_v29 = vpop.f32.mrb[4].mxu1 }
 0x1c2   :  { %v3021_v30 = vpop.f32.mrb[5].mxu1  ;;  %v390_v35 = vmul.f32 %v3019_v29, %v3019_v29 }
 0x1c3   :  { %v388_v31 = vmul.f32 %v3021_v30, %v3021_v30  ;;  %v2554_v32 = vpop.f32.mrb[6].mxu1  ;;  %2560 = vmatmul.mubr.msk.f32.vlgmr.msra.gmra.mrb[8].mxu0 %vm298_vm3, %v3021_v30 }
 0x1c4   :  { %v3027_v33 = vpop.f32.mrb[7].mxu1  ;;  %2562 = vmatprep.mubr.msk.f32.mxu0 %vm2885_vm0, %v2884_v0 }
 0x1c5   :  { %2573 = vmatmul.mubr.msk.f32.vlgmr.msra.gmra.mrb[8].mxu1 %vm298_vm3, %v388_v31  ;;  %v389_v34 = vmul.f32 %v3027_v33, %v3027_v33 }
 0x1c6   :  { %2575 = vmatprep.mubr.msk.f32.mxu1 %vm2885_vm0, %v2884_v0 }
 0x1c7   :  { %2563 = vmatmul.mubr.msk.f32.gmra.mrb[10].mxu0 %vm298_vm3, %v3027_v33 }
 0x1c8   :  { %2565 = vmatprep.mubr.msk.f32.mxu0 %vm2885_vm0, %v2884_v0 }
 0x1c9   :  { %2576 = vmatmul.mubr.msk.f32.gmra.mrb[10].mxu1 %vm298_vm3, %v389_v34 }
 0x1ca   :  { %2578 = vmatprep.mubr.msk.f32.mxu1 %vm2885_vm0, %v2884_v0 }
 0x1cb   :  { %2566 = vmatmul.mubr.msk.f32.gmra.mrb[12].mxu0 %vm298_vm3, %v3019_v29 }
 0x1cc   :  { %2587 = vmatprep.mubr.msk.f32.mxu0 %vm2885_vm0, %v2884_v0 }
 0x1cd   :  { %2579 = vmatmul.mubr.msk.f32.gmra.mrb[12].mxu1 %vm298_vm3, %v390_v35 }
 0x1ce   :  { %2602 = vmatprep.mubr.msk.f32.mxu1 %vm2885_vm0, %v2884_v0 }
 0x296   :  { %v374_v36 = vpop.f32.mrb[8].mxu0 }
 0x297   :  { %v2561_v37 = vpop.f32.mrb[9].mxu0 }
 0x298   :  { %v466_v38 = vpop.f32.mrb[8].mxu1 }
 0x299   :  { %v2574_v39 = vpop.f32.mrb[9].mxu1 }
 0x29a   :  { %v379_v40 = vpop.f32.mrb[10].mxu0 }
 0x29b   :  { %v2810_v41 = vpack.c.bf16 %v379_v40, %v374_v36  ;;  %v2564_v42 = vpop.f32.mrb[11].mxu0  ;;  %v2851_v40 = vld [vmem:[%s3436_s1 + $0x58] sm:$0xff]  }
 0x29c   :  { %v471_v43 = vpop.f32.mrb[10].mxu1 }
 0x29d   :  { %v2813_v44 = vpack.c.bf16 %v471_v43, %v466_v38  ;;  %v2577_v45 = vpop.f32.mrb[11].mxu1  ;;  %2811 = vmatpush3.bf16.msra.mxu0 %v2810_v41  ;;  %v2850_v38 = vld [vmem:[%s3436_s1 + $0x50] sm:$0xff]  }
 0x29e   :  { %v384_v46 = vpop.f32.mrb[12].mxu0  ;;  %2585 = vmatprep.subr.mxu0 %v2884_v0  ;;  %v2852_v43 = vld [vmem:[%s3438_s2 + $0xc] sm:$0xff]  }
 0x29f   :  { %v2567_v47 = vpop.f32.mrb[13].mxu0  ;;  %2814 = vmatpush3.bf16.msra.mxu1 %v2813_v44 }
 0x2a0   :  { %v476_v49 = vpop.f32.mrb[12].mxu1  ;;  %2600 = vmatprep.subr.mxu1 %v2884_v0 }
 0x2a1   :  { %v2580_v50 = vpop.f32.mrb[13].mxu1  ;;  %2586 = vmatpush3.msk.msra.mxu0 %vm490_vm4, %v384_v46 }
 0x2a2   :  { %2588 = vmatmul.mubr.msk.f32.vlgmr.msra.gmra.mrb[14].mxu0 %vm480_vm5, %v3056_v48  ;;  %2611 = vmatprep.subr.mxu0 %v2884_v0 }
 0x2a3   :  { %2601 = vmatpush3.msk.msra.mxu1 %vm490_vm4, %v476_v49  ;;  %2590 = vmatprep.mubr.msk.f32.mxu0 %vm2885_vm0, %v2884_v0 }
 0x2a4   :  { %2603 = vmatmul.mubr.msk.f32.vlgmr.msra.gmra.mrb[14].mxu1 %vm480_vm5, %v3056_v48  ;;  %2622 = vmatprep.subr.mxu1 %v2884_v0 }
 0x2a5   :  { %2605 = vmatprep.mubr.msk.f32.mxu1 %vm2885_vm0, %v2884_v0  ;;  %2612 = vmatpush3.msk.msra.mxu0 %vm688_vm6, %v3100_v53 }
 0x2a6   :  { %2591 = vmatmul.mubr.msk.f32.gmra.mrb[16].mxu0 %vm480_vm5, %v3069_v51  ;;  %2623 = vmatpush3.msk.msra.mxu1 %vm688_vm6, %v3100_v53 }
 0x2a7   :  { %2593 = vmatprep.mubr.msk.f32.mxu0 %vm2885_vm0, %v2884_v0  ;;  %2633 = vmatprep.subr.bf16.mxu0 %v2884_v0 }
 0x2a8   :  { %2606 = vmatmul.mubr.msk.f32.gmra.mrb[16].mxu1 %vm480_vm5, %v3069_v51  ;;  %2641 = vmatprep.subr.bf16.mxu1 %v2884_v0 }
 0x2a9   :  { %2608 = vmatprep.mubr.msk.f32.mxu1 %vm2885_vm0, %v2884_v0 }
 0x2aa   :  { %2594 = vmatmul.mubr.msk.f32.gmra.mrb[18].mxu0 %vm480_vm5, %v3083_v52 }
 0x2ab   :  { %2613 = vmatprep.mubr.msk.f32.mxu0 %vm2885_vm0, %v2884_v0 }
 0x2ac   :  { %2609 = vmatmul.mubr.msk.f32.gmra.mrb[18].mxu1 %vm480_vm5, %v3083_v52 }
 0x2ad   :  { %2624 = vmatprep.mubr.msk.f32.mxu1 %vm2885_vm0, %v2884_v0 }
 0x375   :  { %v560_v62 = vpop.f32.mrb[14].mxu0 }
 0x376   :  { %v574_v1 = vmul.f32 0.0625, %v560_v62  ;;  %v2589_v2 = vpop.f32.mrb[15].mxu0 }
 0x377   :  { %v646_v3 = vpop.f32.mrb[14].mxu1 }
 0x378   :  { %v663_v4 = vmul.f32 %v574_v1, %v574_v1  ;;  %v660_v6 = vmul.f32 0.0625, %v646_v3  ;;  %v2604_v7 = vpop.f32.mrb[15].mxu1  ;;  %2614 = vmatmul.mubr.msk.f32.vlgmr.msra.gmra.mrb[20].mxu0 %vm678_vm7, %v574_v1 }
 0x379   :  { %v565_v8 = vpop.f32.mrb[16].mxu0  ;;  %2616 = vmatprep.mubr.msk.f32.mxu0 %vm2885_vm0, %v2884_v0  ;;  %2634 = vmatpush3.bf16.msra.mxu0 %v2848_v63 }
 0x37a   :  { %v666_v11 = vsub.f32 %v660_v6, %v663_v4  ;;  %v575_v13 = vmul.f32 0.0625, %v565_v8  ;;  %v2592_v14 = vpop.f32.mrb[17].mxu0  ;;  %2635 = vmatprep.subr.bf16.mxu0 %v2884_v0 }
 0x37b   :  { %v651_v15 = vpop.f32.mrb[16].mxu1 }
 0x37c   :  { %v669_v16 = vmax.f32 %v666_v11, 0.0  ;;  %v664_v17 = vmul.f32 %v575_v13, %v575_v13  ;;  %v661_v19 = vmul.f32 0.0625, %v651_v15  ;;  %v2607_v20 = vpop.f32.mrb[17].mxu1  ;;  %2617 = vmatmul.mubr.msk.f32.gmra.mrb[22].mxu0 %vm678_vm7, %v575_v13  ;;  %v2853_v11 = vld [vmem:[%s3438_s2 + $0x14] ss:$0 sps:$4 sm:$0x33]  }
 0x37d   :  { %v570_v21 = vpop.f32.mrb[18].mxu0  ;;  %2619 = vmatprep.mubr.msk.f32.mxu0 %vm2885_vm0, %v2884_v0  ;;  %2636 = vmatpush3.bf16.msra.mxu0 %v2849_v10 }
 0x37e   :  { %v672_v22 = vadd.f32 1e-05, %v669_v16  ;;  %v667_v23 = vsub.f32 %v661_v19, %v664_v17  ;;  %v576_v24 = vmul.f32 0.0625, %v570_v21  ;;  %v2595_v25 = vpop.f32.mrb[19].mxu0 }
 0x37f   :  { %v656_v26 = vpop.f32.mrb[18].mxu1 }
 0x380   :  { %2854 = vrsqrt.f32 %v672_v22  ;;  %v670_v27 = vmax.f32 %v667_v23, 0.0  ;;  %v665_v28 = vmul.f32 %v576_v24, %v576_v24  ;;  %v662_v31 = vmul.f32 0.0625, %v656_v26  ;;  %v2610_v32 = vpop.f32.mrb[19].mxu1  ;;  %2620 = vmatmul.mubr.msk.f32.gmra.mrb[24].mxu0 %vm678_vm7, %v576_v24 }
 0x381   :  { %2637 = vmatprep.mubr.msk.bf16.mxu0 %vm2885_vm0, %v2884_v0 }
 0x382   :  { %v673_v34 = vadd.f32 1e-05, %v670_v27  ;;  %v668_v35 = vsub.f32 %v662_v31, %v665_v28 }
 0x384   :  { %2856 = vrsqrt.f32 %v673_v34  ;;  %v671_v36 = vmax.f32 %v668_v35, 0.0  ;;  %2638 = vmatmul.mubr.msk.bf16.vlgmr.msra.gmra.mrb[28].mxu0 %vm69_vm1, %v2971_v5 }
 0x385   :  { %2655 = vmatprep.mubr.msk.bf16.mxu0 %vm243_vm2, %v2852_v43 }
 0x386   :  { %v674_v37 = vadd.f32 1e-05, %v671_v36 }
 0x388   :  { %2858 = vrsqrt.f32 %v674_v37  ;;  %v2383_v37 = vld [vmem:[%s3442_s3 + $0x28] sm:$0xf] }
 0x38a   :  { %v2855_v39 = vpop.eup %2854 }
 0x38b   :  { %2625 = vmatmul.mubr.msk.f32.vlgmr.msra.gmra.mrb[20].mxu1 %vm678_vm7, %v2855_v39 }
 0x38c   :  { %2627 = vmatprep.mubr.msk.f32.mxu1 %vm2885_vm0, %v2884_v0  ;;  %2642 = vmatpush3.bf16.msra.mxu1 %v2850_v38  ;;  %v2386_v38 = vld [vmem:[%s3443_s4 + $0x28] sm:$0xf] }
 0x38d   :  { %2643 = vmatprep.subr.bf16.mxu1 %v2884_v0 }
 0x38e   :  { %v2857_v41 = vpop.eup %2856 }
 0x38f   :  { %2628 = vmatmul.mubr.msk.f32.gmra.mrb[22].mxu1 %vm678_vm7, %v2857_v41 }
 0x390   :  { %2630 = vmatprep.mubr.msk.f32.mxu1 %vm2885_vm0, %v2884_v0  ;;  %2644 = vmatpush3.bf16.msra.mxu1 %v2851_v40 }
 0x391   :  { %2815 = vmatprep.subr.bf16.mxu1 %v2886_v9 }
 0x392   :  { %v2859_v42 = vpop.eup %2858 }
 0x393   :  { %2631 = vmatmul.mubr.msk.f32.gmra.mrb[24].mxu1 %vm678_vm7, %v2859_v42 }
 0x394   :  { %2645 = vmatprep.mubr.msk.bf16.mxu1 %vm2885_vm0, %v2884_v0 }
 0x397   :  { %2646 = vmatmul.mubr.msk.bf16.vlgmr.msra.gmra.mrb[28].mxu1 %vm69_vm1, %v2971_v5 }
 0x398   :  { %2817 = vmatpush3.bf16.msra.mxu1 %v3002_v12  ;;  %2663 = vmatprep.mubr.msk.f32.mxu1 %vm2885_vm0, %v2884_v0 }
 0x399   :  { %2821 = vmatprep.subr.bf16.mxu1 %v2886_v9 }
 0x44b   :  { %v758_v44 = vpop.f32.mrb[20].mxu0 }
 0x44c   :  { %v861_v45 = vsub.f32 %v3021_v30, %v758_v44  ;;  %v2615_v46 = vpop.f32.mrb[21].mxu0 }
 0x44f   :  { %v763_v47 = vpop.f32.mrb[22].mxu0 }
 0x450   :  { %v862_v5 = vsub.f32 %v3027_v33, %v763_v47  ;;  %v2618_v49 = vpop.f32.mrb[23].mxu0 }
 0x453   :  { %v768_v50 = vpop.f32.mrb[24].mxu0 }
 0x454   :  { %v863_v54 = vsub.f32 %v3019_v29, %v768_v50  ;;  %v2621_v55 = vpop.f32.mrb[25].mxu0 }
 0x457   :  { %v963_v56 = vpop.f32.mrb[28].mxu0 }
 0x458   :  { %v2639_v57 = vpop.f32.mrb[29].mxu0 }
 0x459   :  { %v966_v58 = vpop.f32.mrb[30].mxu0 }
 0x45a   :  { %v970_v59 = vpack.c.bf16 %v966_v58, %v963_v56  ;;  %v2640_v60 = vpop.f32.mrb[31].mxu0 }
 0x45c   :  { %2649 = vmatprep.subr.bf16.mxu0 %v970_v59 }
 0x45d   :  { %2650 = vmatpush3.bf16.msra.mxu0 %v970_v59 }
 0x45e   :  { %v847_v61 = vpop.f32.mrb[20].mxu1  ;;  %2651 = vmatprep.subr.bf16.mxu0 %v3006_v18 }
 0x45f   :  { %v3178_v30 = vmul.f32 %v861_v45, %v847_v61  ;;  %v2626_v62 = vpop.f32.mrb[21].mxu1 }
 0x461   :  { %2652 = vmatpush3.bf16.msra.mxu0 %v3006_v18 }
 0x462   :  { %v852_v33 = vpop.f32.mrb[22].mxu1 }
 0x463   :  { %v3181_v63 = vmul.f32 %v862_v5, %v852_v33  ;;  %v2629_v29 = vpop.f32.mrb[23].mxu1 }
 0x466   :  { %v857_v1 = vpop.f32.mrb[24].mxu1 }
 0x467   :  { %v3183_v2 = vmul.f32 %v863_v54, %v857_v1  ;;  %v2632_v3 = vpop.f32.mrb[25].mxu1 }
 0x46a   :  { %v1022_v4 = vpop.f32.mrb[28].mxu1 }
 0x46b   :  { %v2647_v6 = vpop.f32.mrb[29].mxu1 }
 0x46c   :  { %v1025_v7 = vpop.f32.mrb[30].mxu1 }
 0x46d   :  { %v1029_v8 = vpack.c.bf16 %v1025_v7, %v1022_v4  ;;  %v2648_v10 = vpop.f32.mrb[31].mxu1 }
 0x46f   :  { %2653 = vmatprep.subr.bf16.mxu0 %v1029_v8 }
 0x470   :  { %2654 = vmatpush3.bf16.msra.mxu0 %v1029_v8 }
 0x471   :  { %2818 = vmatprep.subr.bf16.mxu0 %v2886_v9 }
 0x473   :  { %2656 = vmatmul.mubr.msk.bf16.vlgmr.msra.gmra.mrb[32].mxu0 %vm243_vm2, %v2853_v11 }
 0x474   :  { %2820 = vmatpush3.bf16.msra.mxu0 %v3002_v12  ;;  %2676 = vmatprep.mubr.msk.f32.mxu0 %vm2885_vm0, %v2884_v0 }
 0x475   :  { %2824 = vmatprep.subr.bf16.mxu0 %v2886_v9 }
 0x546   :  { %v3194_v18 = vpop.f32.mrb[32].mxu0 }
 0x547   :  { %v3196_v13 = vpop.f32.mrb[33].mxu0  ;;  %v1187_v19 = vmul.f32 %v3194_v18, %v3194_v18 }
 0x548   :  { %v1185_v14 = vmul.f32 %v3196_v13, %v3196_v13  ;;  %v2658_v15 = vpop.f32.mrb[34].mxu0  ;;  %2664 = vmatmul.mubr.msk.f32.vlgmr.msra.gmra.mrb[26].mxu1 %vm298_vm3, %v3196_v13 }
 0x549   :  { %v3202_v16 = vpop.f32.mrb[35].mxu0  ;;  %2666 = vmatprep.mubr.msk.f32.mxu1 %vm2885_vm0, %v2884_v0  ;;  %v873_v15 = vpop.permute.xlu0 %872 }
 0x54a   :  { %2677 = vmatmul.mubr.msk.f32.vlgmr.msra.gmra.mrb[26].mxu0 %vm298_vm3, %v1185_v14  ;;  %v1186_v17 = vmul.f32 %v3202_v16, %v3202_v16 }
 0x54b   :  { %2679 = vmatprep.mubr.msk.f32.mxu0 %vm2885_vm0, %v2884_v0 }
 0x54c   :  { %2667 = vmatmul.mubr.msk.f32.gmra.mrb[32].mxu1 %vm298_vm3, %v3202_v16 }
 0x54d   :  { %2669 = vmatprep.mubr.msk.f32.mxu1 %vm2885_vm0, %v2884_v0 }
 0x54e   :  { %2680 = vmatmul.mubr.msk.f32.gmra.mrb[36].mxu0 %vm298_vm3, %v1186_v17 }
 0x54f   :  { %2682 = vmatprep.mubr.msk.f32.mxu0 %vm2885_vm0, %v2884_v0 }
 0x550   :  { %2670 = vmatmul.mubr.msk.f32.gmra.mrb[34].mxu1 %vm298_vm3, %v3194_v18 }
 0x551   :  { %2691 = vmatprep.mubr.msk.f32.mxu1 %vm2885_vm0, %v2884_v0 }
 0x552   :  { %2683 = vmatmul.mubr.msk.f32.gmra.mrb[38].mxu0 %vm298_vm3, %v1187_v19 }
 0x553   :  { %2706 = vmatprep.mubr.msk.f32.mxu0 %vm2885_vm0, %v2884_v0 }
 0x61b   :  { %v1171_v20 = vpop.f32.mrb[26].mxu1 }
 0x61c   :  { %v2665_v21 = vpop.f32.mrb[27].mxu1 }
 0x61d   :  { %v1263_v22 = vpop.f32.mrb[26].mxu0  ;;  %v1655_v21 = vpop.permute.xlu0 %1654 }
 0x61e   :  { %v2678_v23 = vpop.f32.mrb[27].mxu0 }
 0x61f   :  { %v1176_v24 = vpop.f32.mrb[32].mxu1 }
 0x620   :  { %v2822_v25 = vpack.c.bf16 %v1176_v24, %v1171_v20  ;;  %v2668_v26 = vpop.f32.mrb[33].mxu1 }
 0x621   :  { %v1268_v27 = vpop.f32.mrb[36].mxu0 }
 0x622   :  { %v2825_v28 = vpack.c.bf16 %v1268_v27, %v1263_v22  ;;  %v2681_v31 = vpop.f32.mrb[37].mxu0  ;;  %2823 = vmatpush3.bf16.msra.mxu1 %v2822_v25  ;;  %v894_v22 = vpop.permute.xlu1 %893 }
 0x623   :  { %v1181_v32 = vpop.f32.mrb[34].mxu1  ;;  %2689 = vmatprep.subr.mxu1 %v2884_v0 }
 0x624   :  { %v2671_v34 = vpop.f32.mrb[35].mxu1  ;;  %2826 = vmatpush3.bf16.msra.mxu0 %v2825_v28  ;;  %v878_v28 = vpop.permute.xlu0 %877 }
 0x625   :  { %v1273_v35 = vpop.f32.mrb[38].mxu0  ;;  %2704 = vmatprep.subr.mxu0 %v2884_v0 }
 0x626   :  { %v2684_v36 = vpop.f32.mrb[39].mxu0  ;;  %2690 = vmatpush3.msk.msra.mxu1 %vm490_vm4, %v1181_v32 }
 0x627   :  { %2692 = vmatmul.mubr.msk.f32.vlgmr.msra.gmra.mrb[36].mxu1 %vm480_vm5, %v3056_v48  ;;  %2715 = vmatprep.subr.mxu1 %v2884_v0  ;;  %v885_v36 = vmul.f32 %v873_v15, %v3178_v30 }
 0x628   :  { %2705 = vmatpush3.msk.msra.mxu0 %vm490_vm4, %v1273_v35  ;;  %2694 = vmatprep.mubr.msk.f32.mxu1 %vm2885_vm0, %v2884_v0  ;;  %v899_v35 = vpop.permute.xlu0 %898 }
 0x629   :  { %2707 = vmatmul.mubr.msk.f32.vlgmr.msra.gmra.mrb[40].mxu0 %vm480_vm5, %v3056_v48  ;;  %2716 = vmatpush3.msk.msra.mxu1 %vm688_vm6, %v3100_v53  ;;  %v2384_v48 = vld [vmem:[%s3443_s4 + $0x18] sm:$0xff] }
 0x62a   :  { %2709 = vmatprep.mubr.msk.f32.mxu0 %vm2885_vm0, %v2884_v0  ;;  %2726 = vmatprep.subr.mxu0 %v2884_v0 }
 0x62b   :  { %2695 = vmatmul.mubr.msk.f32.gmra.mrb[38].mxu1 %vm480_vm5, %v3069_v51  ;;  %2727 = vmatpush3.msk.msra.mxu0 %vm688_vm6, %v3100_v53 }
 0x62c   :  { %2697 = vmatprep.mubr.msk.f32.mxu1 %vm2885_vm0, %v2884_v0  ;;  %2827 = vmatprep.subr.bf16.mxu1 %v2886_v9 }
 0x62d   :  { %2710 = vmatmul.mubr.msk.f32.gmra.mrb[42].mxu0 %vm480_vm5, %v3069_v51  ;;  %2830 = vmatprep.subr.bf16.mxu0 %v2886_v9  ;;  %v1791_v9 = vld [vmem:[%s3444_s6] sm:$0xf] }
 0x62e   :  { %2712 = vmatprep.mubr.msk.f32.mxu0 %vm2885_vm0, %v2884_v0  ;;  %1676 = vperm.xlu1 %2838, %v2384_v48   ;;  %v2382_v51 = vld [vmem:[%s3442_s3 + $0x20] sm:$0xff] }
 0x62f   :  { %2698 = vmatmul.mubr.msk.f32.gmra.mrb[40].mxu1 %vm480_vm5, %v3083_v52  ;;  %1794 = vperm.xlu0 %2837, %v1791_v9  }
 0x630   :  { %2717 = vmatprep.mubr.msk.f32.mxu1 %vm2885_vm0, %v2884_v0 }
 0x631   :  { %2713 = vmatmul.mubr.msk.f32.gmra.mrb[44].mxu0 %vm480_vm5, %v3083_v52  ;;  %v2385_v52 = vld [vmem:[%s3443_s4 + $0x20] sm:$0xff] }
 0x632   :  { %2728 = vmatprep.mubr.msk.f32.mxu0 %vm2885_vm0, %v2884_v0  ;;  %1659 = vperm.xlu1 %2838, %v2382_v51  }
 0x636   :  { %1681 = vperm.xlu1 %2838, %v2385_v52   ;;  %v3305_v52 = vadd.f32 %v894_v22, %v885_v36  ;;  %v1874_v22 = vld [vmem:[%s3446_s7] sm:$0xff] }
 0x63a   :  { %1664 = vperm.xlu1 %2838, %v2383_v37   ;;  %v883_v37 = vpop.permute.xlu0 %882 }
 0x63b   :  { %v887_v30 = vmul.f32 %v883_v37, %v3183_v2 }
 0x63e   :  { %1686 = vperm.xlu1 %2838, %v2386_v38  }
 0x6ad   :  { %v1677_v26 = vpop.permute.xlu1 %1676 }
 0x6b1   :  { %v1660_v34 = vpop.permute.xlu1 %1659 }
 0x6b5   :  { %v1682_v48 = vpop.permute.xlu1 %1681 }
 0x6fa   :  { %v1346_v39 = vpop.f32.mrb[36].mxu1 }
 0x6fb   :  { %v1360_v40 = vmul.f32 0.0625, %v1346_v39  ;;  %v2693_v41 = vpop.f32.mrb[37].mxu1 }
 0x6fc   :  { %v1432_v42 = vpop.f32.mrb[40].mxu0 }
 0x6fd   :  { %v1449_v43 = vmul.f32 %v1360_v40, %v1360_v40  ;;  %v1446_v44 = vmul.f32 0.0625, %v1432_v42  ;;  %v2708_v45 = vpop.f32.mrb[41].mxu0  ;;  %2718 = vmatmul.mubr.msk.f32.vlgmr.msra.gmra.mrb[42].mxu1 %vm678_vm7, %v1360_v40  ;;  %v909_v42 = vmax.f32 %v3305_v52, 0.0 }
 0x6fe   :  { %v1351_v46 = vpop.f32.mrb[38].mxu1  ;;  %2720 = vmatprep.mubr.msk.f32.mxu1 %vm2885_vm0, %v2884_v0  ;;  %2829 = vmatpush3.bf16.msra.mxu1 %v3002_v12 }
 0x6ff   :  { %v1452_v47 = vsub.f32 %v1446_v44, %v1449_v43  ;;  %v1361_v5 = vmul.f32 0.0625, %v1351_v46  ;;  %v2696_v49 = vpop.f32.mrb[39].mxu1  ;;  %2770 = vmatprep.subr.mxu1 %v2884_v0  ;;  %v1665_v43 = vpop.permute.xlu1 %1664 }
 0x700   :  { %v1437_v50 = vpop.f32.mrb[42].mxu0 }
 0x701   :  { %v1455_v54 = vmax.f32 %v1452_v47, 0.0  ;;  %v1450_v55 = vmul.f32 %v1361_v5, %v1361_v5  ;;  %v1447_v56 = vmul.f32 0.0625, %v1437_v50  ;;  %v2711_v57 = vpop.f32.mrb[43].mxu0  ;;  %2721 = vmatmul.mubr.msk.f32.gmra.mrb[44].mxu1 %vm678_vm7, %v1361_v5  ;;  %v904_v47 = vpop.permute.xlu0 %903 }
 0x702   :  { %v1356_v58 = vpop.f32.mrb[40].mxu1  ;;  %2723 = vmatprep.mubr.msk.f32.mxu1 %vm2885_vm0, %v2884_v0 }
 0x703   :  { %v1458_v59 = vadd.f32 1e-05, %v1455_v54  ;;  %v1453_v60 = vsub.f32 %v1447_v56, %v1450_v55  ;;  %v1362_v61 = vmul.f32 0.0625, %v1356_v58  ;;  %v2699_v12 = vpop.f32.mrb[41].mxu1  ;;  %v3322_v56 = vadd.f32 %v904_v47, %v887_v30  ;;  %v1687_v58 = vpop.permute.xlu1 %1686 }
 0x704   :  { %v1442_v62 = vpop.f32.mrb[44].mxu0 }
 0x705   :  { %2860 = vrsqrt.f32 %v1458_v59  ;;  %v1456_v33 = vmax.f32 %v1453_v60, 0.0  ;;  %v1451_v29 = vmul.f32 %v1362_v61, %v1362_v61  ;;  %v1448_v1 = vmul.f32 0.0625, %v1442_v62  ;;  %2724 = vmatmul.mubr.msk.f32.gmra.mrb[46].mxu1 %vm678_vm7, %v1362_v61  ;;  %v2714_v3 = vpop.f32.mrb[45].mxu0  ;;  %v1795_v15 = vpop.permute.xlu0 %1794 }
 0x706   :  { %2741 = vmatprep.mubr.msk.f32.mxu1 %vm2885_vm0, %v2884_v0  ;;  %v911_v61 = vmax.f32 %v3322_v56, 0.0 }
 0x707   :  { %v1459_v4 = vadd.f32 1e-05, %v1456_v33  ;;  %v1454_v6 = vsub.f32 %v1448_v1, %v1451_v29 }
 0x709   :  { %2862 = vrsqrt.f32 %v1459_v4  ;;  %v1457_v7 = vmax.f32 %v1454_v6, 0.0 }
 0x70b   :  { %v1460_v8 = vadd.f32 1e-05, %v1457_v7 }
 0x70d   :  { %2864 = vrsqrt.f32 %v1460_v8 }
 0x70f   :  { %v2861_v10 = vpop.eup %2860 }
 0x710   :  { %2729 = vmatmul.mubr.msk.f32.vlgmr.msra.gmra.mrb[46].mxu0 %vm678_vm7, %v2861_v10 }
 0x711   :  { %2731 = vmatprep.mubr.msk.f32.mxu0 %vm2885_vm0, %v2884_v0 }
 0x713   :  { %v2863_v11 = vpop.eup %2862 }
 0x714   :  { %2732 = vmatmul.mubr.msk.f32.gmra.mrb[48].mxu0 %vm678_vm7, %v2863_v11 }
 0x715   :  { %2734 = vmatprep.mubr.msk.f32.mxu0 %vm2885_vm0, %v2884_v0 }
 0x717   :  { %v2865_v14 = vpop.eup %2864 }
 0x718   :  { %2735 = vmatmul.mubr.msk.f32.gmra.mrb[50].mxu0 %vm678_vm7, %v2865_v14  ;;  %v1790_v14 = vld [vmem:[%s3445_s5] sm:$0xf] }
 0x719   :  { %2756 = vmatprep.mubr.msk.f32.mxu0 %vm2885_vm0, %v2884_v0 }
 0x7d0   :  { %v1539_v17 = vpop.f32.mrb[42].mxu1 }
 0x7d1   :  { %v1642_v19 = vsub.f32 %v3196_v13, %v1539_v17  ;;  %v2719_v20 = vpop.f32.mrb[43].mxu1 }
 0x7d4   :  { %v1544_v23 = vpop.f32.mrb[44].mxu1 }
 0x7d5   :  { %v1643_v24 = vsub.f32 %v3202_v16, %v1544_v23  ;;  %v2722_v25 = vpop.f32.mrb[45].mxu1  ;;  %v886_v16 = vmul.f32 %v878_v28, %v3181_v63  ;;  %v2396_v23 = vld [vmem:[%s3446_s7 + $0x18] sm:$0xff] }
 0x7d6   :  { %v2397_v25 = vld [vmem:[%s3446_s7 + $0x20] sm:$0xff] }
 0x7d7   :  { %v3311_v44 = vadd.f32 %v899_v35, %v886_v16 }
 0x7d8   :  { %v1549_v27 = vpop.f32.mrb[46].mxu1 }
 0x7d9   :  { %v1644_v31 = vsub.f32 %v3194_v18, %v1549_v27  ;;  %v2725_v32 = vpop.f32.mrb[47].mxu1  ;;  %v910_v55 = vmax.f32 %v3311_v44, 0.0  ;;  %v2398_v27 = vld [vmem:[%s3446_s7 + $0x28] sm:$0xf] }
 0x7e3   :  { %v1628_v9 = vpop.f32.mrb[46].mxu0 }
 0x7e4   :  { %v1645_v13 = vmul.f32 %v1642_v19, %v1628_v9  ;;  %v2730_v51 = vpop.f32.mrb[47].mxu0 }
 0x7e6   :  { %v1667_v38 = vmul.f32 %v1655_v21, %v1645_v13 }
 0x7e7   :  { %v1633_v39 = vpop.f32.mrb[48].mxu0 }
 0x7e8   :  { %v3308_v40 = vadd.f32 %v1677_v26, %v1667_v38  ;;  %v1646_v41 = vmul.f32 %v1643_v24, %v1633_v39  ;;  %v2733_v18 = vpop.f32.mrb[49].mxu0  ;;  %v1875_v24 = vld [vmem:[%s3446_s7 + $0x8] sm:$0xff]  ;;  %v1876_v26 = vld [vmem:[%s3446_s7 + $0x10] sm:$0xf] }
 0x7ea   :  { %v1692_v45 = vmax.f32 %v3308_v40, 0.0  ;;  %v1668_v46 = vmul.f32 %v1660_v34, %v1646_v41 }
 0x7eb   :  { %v1638_v5 = vpop.f32.mrb[50].mxu0 }
 0x7ec   :  { %v1695_v63 = vadd.f32 %v1692_v45, %v909_v42  ;;  %v3319_v49 = vadd.f32 %v1682_v48, %v1668_v46  ;;  %v1647_v50 = vmul.f32 %v1644_v31, %v1638_v5  ;;  %v2736_v54 = vpop.f32.mrb[51].mxu0 }
 0x7ee   :  { %v1693_v2 = vmax.f32 %v3319_v49, 0.0  ;;  %v1669_v57 = vmul.f32 %v1665_v43, %v1647_v50  ;;  %2742 = vmatmul.mubr.msk.f32.vlgmr.msra.gmra.mrb[48].mxu1 %vm298_vm3, %v1695_v63 }
 0x7ef   :  { %2744 = vmatprep.mubr.msk.f32.mxu1 %vm2885_vm0, %v2884_v0 }
 0x7f0   :  { %v1696_v59 = vadd.f32 %v1693_v2, %v910_v55  ;;  %v3332_v60 = vadd.f32 %v1687_v58, %v1669_v57 }
 0x7f2   :  { %v1694_v12 = vmax.f32 %v3332_v60, 0.0  ;;  %2745 = vmatmul.mubr.msk.f32.gmra.mrb[50].mxu1 %vm298_vm3, %v1696_v59 }
 0x7f3   :  { %2747 = vmatprep.mubr.msk.f32.mxu1 %vm2885_vm0, %v2884_v0 }
 0x7f4   :  { %v1697_v62 = vadd.f32 %v1694_v12, %v911_v61 }
 0x7f6   :  { %2748 = vmatmul.mubr.msk.f32.gmra.mrb[52].mxu1 %vm298_vm3, %v1697_v62 }
 0x7f7   :  { %2772 = vmatprep.mubr.msk.f32.mxu1 %vm2885_vm0, %v2884_v0 }
 0x8c1   :  { %v1773_v33 = vpop.f32.mrb[48].mxu1 }
 0x8c2   :  { %v2743_v29 = vpop.f32.mrb[49].mxu1  ;;  %v1787_v3 = vmul.f32 0.125, %v1773_v33 }
 0x8c5   :  { %v1778_v1 = vpop.f32.mrb[50].mxu1 }
 0x8c6   :  { %v1788_v4 = vmul.f32 0.125, %v1778_v1  ;;  %v2746_v6 = vpop.f32.mrb[51].mxu1 }
 0x8c8   :  { %v2831_v7 = vpack.c.bf16 %v1788_v4, %v1787_v3 }
 0x8c9   :  { %v1783_v8 = vpop.f32.mrb[52].mxu1 }
 0x8ca   :  { %v2749_v10 = vpop.f32.mrb[53].mxu1  ;;  %2832 = vmatpush3.bf16.msra.mxu0 %v2831_v7  ;;  %v1789_v11 = vmul.f32 0.125, %v1783_v8 }
 0x8cb   :  { %2754 = vmatprep.subr.mxu0 %v2884_v0 }
 0x8ce   :  { %2755 = vmatpush3.msk.msra.mxu0 %vm490_vm4, %v1789_v11 }
 0x8cf   :  { %2757 = vmatmul.mubr.msk.f32.vlgmr.msra.gmra.mrb[52].mxu0 %vm480_vm5, %v1790_v14  ;;  %2759 = vmatprep.subr.mxu0 %v2884_v0 }
 0x8d0   :  { %2761 = vmatprep.mubr.msk.f32.mxu0 %vm2885_vm0, %v2884_v0 }
 0x9a2   :  { %v1869_v17 = vpop.f32.mrb[52].mxu0 }
 0x9a3   :  { %v1870_v19 = vadd.f32 %v1869_v17, %v1795_v15  ;;  %v2758_v20 = vpop.f32.mrb[53].mxu0 }
 0x9a5   :  { %v1873_v21 = vmax.f32 %v1870_v19, 0.0 }
 0x9a7   :  { %2760 = vmatpush3.msk.msra.mxu0 %vm490_vm4, %v1873_v21  ;;  %2771 = vmatpush3.msk.msra.mxu1 %vm490_vm4, %v1873_v21 }
 0x9a8   :  { %2762 = vmatmul.mubr.msk.f32.vlgmr.msra.gmra.mrb[54].mxu0 %vm1877_vm8, %v1874_v22  ;;  %2773 = vmatmul.mubr.msk.f32.vlgmr.msra.gmra.mrb[54].mxu1 %vm1877_vm8, %v2396_v23 }
 0x9a9   :  { %2764 = vmatprep.mubr.msk.f32.mxu0 %vm2885_vm0, %v2884_v0  ;;  %2775 = vmatprep.mubr.msk.f32.mxu1 %vm2885_vm0, %v2884_v0 }
 0x9aa   :  { %2781 = vmatprep.subr.mxu0 %v2884_v0  ;;  %2792 = vmatprep.subr.mxu1 %v2884_v0 }
 0x9ab   :  { %2782 = vmatpush3.msk.msra.mxu0 %vm688_vm6, %v3100_v53  ;;  %2793 = vmatpush3.msk.msra.mxu1 %vm688_vm6, %v3100_v53 }
 0x9ac   :  { %2765 = vmatmul.mubr.msk.f32.gmra.mrb[56].mxu0 %vm1877_vm8, %v1875_v24  ;;  %2776 = vmatmul.mubr.msk.f32.gmra.mrb[56].mxu1 %vm1877_vm8, %v2397_v25 }
 0x9ad   :  { %2767 = vmatprep.mubr.msk.f32.mxu0 %vm2885_vm0, %v2884_v0  ;;  %2778 = vmatprep.mubr.msk.f32.mxu1 %vm2885_vm0, %v2884_v0 }
 0x9b0   :  { %2768 = vmatmul.mubr.msk.f32.gmra.mrb[58].mxu0 %vm1877_vm8, %v1876_v26  ;;  %2779 = vmatmul.mubr.msk.f32.gmra.mrb[58].mxu1 %vm1877_vm8, %v2398_v27 }
 0x9b1   :  { %2783 = vmatprep.mubr.msk.f32.mxu0 %vm2885_vm0, %v2884_v0  ;;  %2794 = vmatprep.mubr.msk.f32.mxu1 %vm2885_vm0, %v2884_v0 }
 0xa7b   :  { %v1956_v53 = vpop.f32.mrb[54].mxu0  ;;  %v2049_v28 = vpop.f32.mrb[54].mxu1 }
 0xa7c   :  { %v2063_v31 = vmax.f32 %v1956_v53, %v2049_v28  ;;  %v2763_v32 = vpop.f32.mrb[55].mxu0  ;;  %v2774_v34 = vpop.f32.mrb[55].mxu1 }
 0xa7e   :  { %v2066_v35 = vsub.f32 %v1956_v53, %v2063_v31  ;;  %v2075_v36 = vsub.f32 %v2049_v28, %v2063_v31 }
 0xa7f   :  { %v1961_v48 = vpop.f32.mrb[56].mxu0  ;;  %v2054_v9 = vpop.f32.mrb[56].mxu1 }
 0xa80   :  { %v2069_v13 = vmul.f32 1.442695, %v2066_v35  ;;  %v2078_v51 = vmul.f32 1.442695, %v2075_v36  ;;  %v2064_v37 = vmax.f32 %v1961_v48, %v2054_v9  ;;  %v2766_v16 = vpop.f32.mrb[57].mxu0  ;;  %v2777_v38 = vpop.f32.mrb[57].mxu1 }
 0xa82   :  { %2866 = vpow2.f32 %v2069_v13  ;;  %v2067_v39 = vsub.f32 %v1961_v48, %v2064_v37  ;;  %v2076_v41 = vsub.f32 %v2054_v9, %v2064_v37 }
 0xa83   :  { %2868 = vpow2.f32 %v2078_v51  ;;  %v1966_v18 = vpop.f32.mrb[58].mxu0  ;;  %v2059_v43 = vpop.f32.mrb[58].mxu1 }
 0xa84   :  { %v2071_v30 = vmul.f32 1.442695, %v2067_v39  ;;  %v2080_v46 = vmul.f32 1.442695, %v2076_v41  ;;  %v2065_v47 = vmax.f32 %v1966_v18, %v2059_v43  ;;  %v2769_v5 = vpop.f32.mrb[59].mxu0  ;;  %v2780_v63 = vpop.f32.mrb[59].mxu1 }
 0xa86   :  { %2870 = vpow2.f32 %v2071_v30  ;;  %v2068_v50 = vsub.f32 %v1966_v18, %v2065_v47  ;;  %v2077_v54 = vsub.f32 %v2059_v43, %v2065_v47 }
 0xa87   :  { %2872 = vpow2.f32 %v2080_v46 }
 0xa88   :  { %v2073_v57 = vmul.f32 1.442695, %v2068_v50  ;;  %v2082_v58 = vmul.f32 1.442695, %v2077_v54 }
 0xa8a   :  { %2874 = vpow2.f32 %v2073_v57 }
 0xa8b   :  { %2876 = vpow2.f32 %v2082_v58 }
 0xa8c   :  { %v2867_v59 = vpop.eup %2866 }
 0xa8d   :  { %v2869_v62 = vpop.eup %2868 }
 0xa8e   :  { %v2084_v33 = vadd.f32 %v2869_v62, %v2867_v59 }
 0xa90   :  { %v2871_v29 = vpop.eup %2870  ;;  %2878 = vrcp.f32 %v2084_v33 }
 0xa91   :  { %v2873_v1 = vpop.eup %2872 }
 0xa92   :  { %v2085_v3 = vadd.f32 %v2873_v1, %v2871_v29 }
 0xa94   :  { %v2875_v4 = vpop.eup %2874  ;;  %2880 = vrcp.f32 %v2085_v3 }
 0xa95   :  { %v2877_v6 = vpop.eup %2876 }
 0xa96   :  { %v2086_v7 = vadd.f32 %v2877_v6, %v2875_v4 }
 0xa98   :  { %2882 = vrcp.f32 %v2086_v7 }
 0xa9a   :  { %v2879_v8 = vpop.eup %2878 }
 0xa9b   :  { %v2090_v10 = vmul.f32 %v2879_v8, %v2867_v59  ;;  %v2188_v11 = vmul.f32 %v2879_v8, %v2869_v62 }
 0xa9d   :  { %2784 = vmatmul.mubr.msk.f32.vlgmr.msra.gmra.mrb[60].mxu0 %vm678_vm7, %v2090_v10  ;;  %2795 = vmatmul.mubr.msk.f32.vlgmr.msra.gmra.mrb[60].mxu1 %vm678_vm7, %v2188_v11 }
 0xa9e   :  { %v2881_v14 = vpop.eup %2880  ;;  %2786 = vmatprep.mubr.msk.f32.mxu0 %vm2885_vm0, %v2884_v0  ;;  %2797 = vmatprep.mubr.msk.f32.mxu1 %vm2885_vm0, %v2884_v0 }
 0xa9f   :  { %v2091_v15 = vmul.f32 %v2881_v14, %v2871_v29  ;;  %v2189_v17 = vmul.f32 %v2881_v14, %v2873_v1 }
 0xaa1   :  { %2787 = vmatmul.mubr.msk.f32.gmra.mrb[62].mxu0 %vm678_vm7, %v2091_v15  ;;  %2798 = vmatmul.mubr.msk.f32.gmra.mrb[62].mxu1 %vm678_vm7, %v2189_v17 }
 0xaa2   :  { %v2883_v19 = vpop.eup %2882  ;;  %2789 = vmatprep.mubr.msk.f32.mxu0 %vm2885_vm0, %v2884_v0  ;;  %2800 = vmatprep.mubr.msk.f32.mxu1 %vm2885_vm0, %v2884_v0 }
 0xaa3   :  { %v2092_v20 = vmul.f32 %v2883_v19, %v2875_v4  ;;  %v2190_v21 = vmul.f32 %v2883_v19, %v2877_v6 }
 0xaa5   :  { %2790 = vmatmul.mubr.msk.f32.gmra.mrb[64].mxu0 %vm678_vm7, %v2092_v20  ;;  %2801 = vmatmul.mubr.msk.f32.gmra.mrb[64].mxu1 %vm678_vm7, %v2190_v21 }
 0xb70   :  { %v2168_v22 = vpop.f32.mrb[60].mxu0  ;;  %v2266_v23 = vpop.f32.mrb[60].mxu1 }
 0xb71   :  { %v2182_v24 = vmul.f32 %v2168_v22, %v909_v42  ;;  %v2280_v25 = vmul.f32 %v2266_v23, %v1692_v45  ;;  %v2785_v26 = vpop.f32.mrb[61].mxu0  ;;  %v2796_v27 = vpop.f32.mrb[61].mxu1 }
 0xb73   :  { %v2283_v53 = vadd.f32 %v2280_v25, %v2182_v24 }
 0xb74   :  { %v2173_v28 = vpop.f32.mrb[62].mxu0  ;;  %v2271_v31 = vpop.f32.mrb[62].mxu1 }
 0xb75   :  { %2286 = vst.msk [vmem:[%s3447_s11] sm:$0xff] %vm298_vm3, %v2283_v53  ;;  %v2183_v0 = vmul.f32 %v2173_v28, %v910_v55  ;;  %v2281_v52 = vmul.f32 %v2271_v31, %v1693_v2  ;;  %v2788_v42 = vpop.f32.mrb[63].mxu0  ;;  %v2799_v32 = vpop.f32.mrb[63].mxu1 }
 0xb77   :  { %v2284_v40 = vadd.f32 %v2281_v52, %v2183_v0 }
 0xb78   :  { %v2178_v45 = vpop.f32.mrb[64].mxu0  ;;  %v2276_v34 = vpop.f32.mrb[64].mxu1 }
 0xb79   :  { %2287 = vst.msk [vmem:[%s3447_s11 + $0x8] sm:$0xff] %vm298_vm3, %v2284_v40  ;;  %v2184_v35 = vmul.f32 %v2178_v45, %v911_v61  ;;  %v2282_v44 = vmul.f32 %v2276_v34, %v1694_v12  ;;  %v2791_v55 = vpop.f32.mrb[65].mxu0  ;;  %v2802_v36 = vpop.f32.mrb[65].mxu1 }
 0xb7b   :  { %v2285_v49 = vadd.f32 %v2282_v44, %v2184_v35 }
 0xb7d   :  { %2289 = vst.msk [vmem:[%s3447_s11 + $0x10] sm:$0xf] %vm2288_vm9, %v2285_v49 }

</bundles_post_ra>
